<compile_context>
chip_gen: v7x
topology: tpu7x:2x2x1
jax: 0.10.0
libtpu: 0.0.40
codegen_flags: <defaults>
</compile_context>

<pallas_src>
import functools

import numpy as np
import jax
import jax.numpy as jnp
from jax.experimental import pallas as pl
from jax.experimental.pallas import tpu as pltpu

IMPOSSIBLE = -10000.0


def _crf_viterbi_kernel(feat_ref, mask_ref, w_ref, b_ref, trans_ref, stop_ref,
                        path_ref, score_ref, bps_ref, *, start_idx):
    """Full Viterbi decode for one batch block, batch on the lane axis.

    feat_ref : (S, Bb, D)  input features (pre-fc)
    mask_ref : (S, Bb)     0/1 mask (float), contiguous prefix per sequence
    w_ref    : (T, D)      fc weight (nn.Linear layout)
    b_ref    : (T, 1)      fc bias as a column
    trans_ref: (T, T)      transitions[i, j] = score(j -> i)
    stop_ref : (T, 1)      transitions[stop_idx, :] as a column
    path_ref : (S, Bb)     decoded tags (output; padded positions = 0)
    score_ref: (1, Bb)     best final score (output)
    bps_ref  : (S, T, Bb)  backpointers -- VMEM scratch, never written to HBM
    """
    S, Bb, D = feat_ref.shape
    T = trans_ref.shape[0]

    # ---- 1) emission projection: one MXU matmul, already batch-on-lanes ----
    # (T, D) x (S*Bb, D)^T -> (T, S*Bb); column s*Bb + b = step s, batch b.
    # The reshape only collapses leading dims; Bb is padded to a multiple of 8
    # by the wrapper so the collapse is tile-exact (no relayout copy).
    feat2d = feat_ref[...].reshape(S * Bb, D)
    emit = jax.lax.dot_general(
        w_ref[...], feat2d,
        dimension_numbers=(((1,), (1,)), ((), ())),
        preferred_element_type=jnp.float32)
    emit = emit + b_ref[...]                                       # (T, S*Bb)

    mask = mask_ref[...]                                           # (S, Bb) f32
    trans = trans_ref[...]                                         # (T, T)

    # Hoisted loop invariants (iota + transition-column broadcasts).
    row_t = jax.lax.broadcasted_iota(jnp.int32, (T, Bb), 0)        # tag index
    trans_cols = [jnp.broadcast_to(trans[:, j:j + 1], (T, Bb)) for j in range(T)]

    # ---- 2) Viterbi max-plus recurrence, unrolled VPU argmax over prev tag ----
    # score[i, b] = best path score ending in tag i for batch element b.
    # TODO(synk): for long sequences (S >= ~64) switch both unrolled time loops
    # to lax.fori_loop(..., unroll=4..8) with emit staged in a VMEM scratch.
    score = jnp.where(row_t == start_idx,
                      jnp.float32(0.0), jnp.float32(IMPOSSIBLE))   # (T, Bb)
    for s in range(S):
        best = score[0:1, :] + trans_cols[0]                       # (T, Bb)
        bp = jnp.zeros((T, Bb), jnp.int32)
        for j in range(1, T):
            cand = score[j:j + 1, :] + trans_cols[j]               # (T, Bb)
            take = cand > best                                     # first idx wins
            best = jnp.where(take, cand, best)
            bp = jnp.where(take, j, bp)
        bps_ref[s] = bp                                            # dense (T, Bb) store
        new_score = best + emit[:, s * Bb:(s + 1) * Bb]            # + emission(dest)
        score = jnp.where(mask[s:s + 1, :] > 0.0, new_score, score)

    # ---- 3) finalize: stop transition, best score / tag (unrolled over T) ----
    final = score + stop_ref[...]                                  # (T, Bb)
    best_sc = final[0:1, :]
    best_tag = jnp.zeros((1, Bb), jnp.int32)
    for i in range(1, T):
        cand = final[i:i + 1, :]
        take = cand > best_sc
        best_sc = jnp.where(take, cand, best_sc)
        best_tag = jnp.where(take, i, best_tag)
    score_ref[...] = best_sc

    # ---- 4) on-device backtracking, O(S): one row store per step ----
    cur = best_tag                                                 # (1, Bb)
    for t in range(S - 1, -1, -1):
        if t < S - 1:
            use_bp = (mask[t:t + 1, :] > 0.0) & (mask[t + 1:t + 2, :] > 0.0)
            bp_next = bps_ref[t + 1]                               # (T, Bb)
            stepped = bp_next[0:1, :]                              # gather bp_next[cur]
            for i in range(1, T):                                  # unrolled VPU select
                stepped = jnp.where(cur == i, bp_next[i:i + 1, :], stepped)
            cur = jnp.where(use_bp, stepped, cur)
        path_ref[pl.ds(t, 1), :] = jnp.where(mask[t:t + 1, :] > 0.0, cur, 0)


def _pick_batch_block(b_pad, seq_len, d, t, vmem_budget_bytes=24 * 1024 * 1024):
    """Largest batch block that fits a conservative VMEM budget."""
    # per-batch-element footprint: double-buffered feature/mask inputs,
    # outputs, and the int32 backpointer scratch (all 4-byte).
    per_b = 4 * (2 * seq_len * d + 2 * seq_len + 2 * seq_len + 2 + seq_len * t)
    bb = int(vmem_budget_bytes // max(per_b, 1))
    if bb >= b_pad:
        return b_pad                       # single grid step (preferred)
    bb = max(8, (bb // 8) * 8)             # keep the collapse-reshape tile-exact
    if bb >= 128:
        bb = (bb // 128) * 128             # lane-dense blocks when splitting
    return min(bb, b_pad)


@functools.partial(jax.jit, static_argnames=("start_idx", "stop_idx"))
def crf_viterbi_pallas(features, masks, fc_weight, fc_bias, transitions,
                       *, start_idx, stop_idx):
    """features: [B, S, D] f32; masks: [B, S] (0/1).
    Returns (paths [B, S] int32 padded with 0, best_score [B] f32)."""
    B, S, D = features.shape
    T = transitions.shape[0]

    # Batch goes on the lane (last) axis inside the kernel; pad to a multiple
    # of 8 so all sublane collapses are tile-exact (padded lanes are masked).
    B_pad = ((B + 7) // 8) * 8
    feats = jnp.transpose(features.astype(jnp.float32), (1, 0, 2))   # [S, B, D]
    mask_sb = jnp.transpose(masks.astype(jnp.float32), (1, 0))       # [S, B]
    if B_pad != B:
        feats = jnp.pad(feats, ((0, 0), (0, B_pad - B), (0, 0)))
        mask_sb = jnp.pad(mask_sb, ((0, 0), (0, B_pad - B)))

    w = fc_weight.astype(jnp.float32)                                # [T, D]
    b_col = fc_bias.astype(jnp.float32).reshape(T, 1)                # [T, 1]
    trans = transitions.astype(jnp.float32)                          # [T, T]
    stop_col = trans[stop_idx].reshape(T, 1)                         # [T, 1]

    batch_block = _pick_batch_block(B_pad, S, D, T)
    nb = pl.cdiv(B_pad, batch_block)

    kernel = functools.partial(_crf_viterbi_kernel, start_idx=start_idx)

    path_sb, score_1b = pl.pallas_call(
        kernel,
        out_shape=(
            jax.ShapeDtypeStruct((S, B_pad), jnp.int32),
            jax.ShapeDtypeStruct((1, B_pad), jnp.float32),
        ),
        grid_spec=pltpu.PrefetchScalarGridSpec(
            num_scalar_prefetch=0,
            grid=(nb,),
            in_specs=[
                pl.BlockSpec((S, batch_block, D), lambda i: (0, i, 0)),  # features
                pl.BlockSpec((S, batch_block), lambda i: (0, i)),        # mask
                pl.BlockSpec((T, D), lambda i: (0, 0)),                  # fc weight
                pl.BlockSpec((T, 1), lambda i: (0, 0)),                  # fc bias col
                pl.BlockSpec((T, T), lambda i: (0, 0)),                  # transitions
                pl.BlockSpec((T, 1), lambda i: (0, 0)),                  # stop col
            ],
            out_specs=[
                pl.BlockSpec((S, batch_block), lambda i: (0, i)),        # path
                pl.BlockSpec((1, batch_block), lambda i: (0, i)),        # best score
            ],
            # TODO(synk): for large S/T/batch_block store backpointers as int8
            # (T < 256) or pack 4/int32 to cut this scratch 4x on v7x.
            scratch_shapes=[pltpu.VMEM((S, T, batch_block), jnp.int32)],
        ),
        compiler_params=pltpu.CompilerParams(
            dimension_semantics=("parallel",),
            vmem_limit_bytes=32 * 1024 * 1024),
    )(feats, mask_sb, w, b_col, trans, stop_col)

    paths = jnp.transpose(path_sb[:, :B], (1, 0))                    # [B, S]
    best_score = score_1b[0, :B]                                     # [B]
    return paths, best_score


def crf_forward(features, masks, fc_weight, fc_bias, transitions,
                start_idx, stop_idx):
    """Mirrors CRF.forward: returns (best_score [B], best_paths list of lists)."""
    S = features.shape[1]
    masks = masks[:, :S]
    paths, best_score = crf_viterbi_pallas(
        features, masks, fc_weight, fc_bias, transitions,
        start_idx=start_idx, stop_idx=stop_idx)
    best_score = jax.block_until_ready(best_score)

    # TODO(synk): the ragged list-of-lists output (per-sequence variable length)
    # has no fixed-shape device equivalent; only the trivial O(B) trim stays on
    # host (the decode itself runs fully on-device).
    paths_np = np.asarray(paths)
    lens = np.asarray(masks).sum(axis=1).astype(np.int64)
    best_paths = [[int(v) for v in paths_np[b, :int(lens[b])]]
                  for b in range(paths_np.shape[0])]
    return best_score, best_paths


def crf_forward_ref_numpy(features, masks, fc_weight, fc_bias, transitions,
                          start_idx, stop_idx):
    """Pure numpy mirror of the PyTorch forward for verification."""
    feats = np.asarray(features, np.float32)
    masks = np.asarray(masks, np.float32)
    w = np.asarray(fc_weight, np.float32)
    b = np.asarray(fc_bias, np.float32)
    trans = np.asarray(transitions, np.float32)

    emit = feats @ w.T + b                       # [B, S, T]
    B, S, T = emit.shape
    bps = np.zeros((B, S, T), dtype=np.int64)
    max_score = np.full((B, T), IMPOSSIBLE, dtype=np.float32)
    max_score[:, start_idx] = 0.0
    for t in range(S):
        mask_t = masks[:, t:t + 1]
        acc = max_score[:, None, :] + trans[None, :, :]
        bps[:, t] = acc.argmax(-1)
        acc_max = acc.max(-1) + emit[:, t]
        max_score = acc_max * mask_t + max_score * (1 - mask_t)
    max_score = max_score + trans[stop_idx][None, :]
    best_score = max_score.max(-1)
    best_tag = max_score.argmax(-1)
    best_paths = []
    for bb in range(B):
        bt = int(best_tag[bb])
        L = int(masks[bb].sum())
        path = [bt]
        for bps_t in bps[bb, :L][::-1]:
            bt = int(bps_t[bt])
            path.append(bt)
        best_paths.append(path[-2::-1])
    return best_score, best_paths


if __name__ == "__main__":
    # Module config: CRF(in_features=32, num_tags=6) -> T = num_tags + 2 = 8
    B, S, D = 2, 8, 32
    num_tags = 6
    T = num_tags + 2
    start_idx = T - 2
    stop_idx = T - 1

    key = jax.random.PRNGKey(0)
    k_feat, k_w, k_b, k_trans = jax.random.split(key, 4)

    features = jax.random.normal(k_feat, (B, S, D), dtype=jnp.float32)
    # masks: batch 0 has full length S, batch 1 has length 5 (padded tail)
    lengths = jnp.array([S, 5], dtype=jnp.int32)
    masks = (jnp.arange(S)[None, :] < lengths[:, None]).astype(jnp.float32)

    # Deterministic parameter init (shapes follow nn.Linear(D, T) + transitions)
    fc_weight = jax.random.normal(k_w, (T, D), dtype=jnp.float32) * 0.1
    fc_bias = jax.random.normal(k_b, (T,), dtype=jnp.float32) * 0.1
    transitions = jax.random.normal(k_trans, (T, T), dtype=jnp.float32)
    transitions = transitions.at[start_idx, :].set(IMPOSSIBLE)
    transitions = transitions.at[:, stop_idx].set(IMPOSSIBLE)

    best_score, best_paths = crf_forward(
        features, masks, fc_weight, fc_bias, transitions, start_idx, stop_idx)
    best_score = jax.block_until_ready(best_score)

    # Verify against a numpy mirror of the PyTorch reference.
    ref_score, ref_paths = crf_forward_ref_numpy(
        features, masks, fc_weight, fc_bias, transitions, start_idx, stop_idx)
    np.testing.assert_allclose(np.asarray(best_score), ref_score,
                               rtol=1e-4, atol=1e-4)
    assert [list(map(int, p)) for p in best_paths] == \
           [list(map(int, p)) for p in ref_paths], "best_paths mismatch"

    print("KERNEL_OK")
</pallas_src>

<mosaic_0001>
module attributes {stable_mosaic.version = 11 : i64} {
  func.func @_crf_viterbi_kernel(%arg0: i32, %arg1: memref<8x8x32xf32, #tpu.memory_space<vmem>>, %arg2: memref<8x8xf32, #tpu.memory_space<vmem>>, %arg3: memref<8x32xf32, #tpu.memory_space<vmem>>, %arg4: memref<8x1xf32, #tpu.memory_space<vmem>>, %arg5: memref<8x8xf32, #tpu.memory_space<vmem>>, %arg6: memref<8x1xf32, #tpu.memory_space<vmem>>, %arg7: memref<8x8xi32, #tpu.memory_space<vmem>>, %arg8: memref<1x8xf32, #tpu.memory_space<vmem>>, %arg9: memref<8x8x8xi32, #tpu.memory_space<vmem>>) attributes {dimension_semantics = [#tpu.dimension_semantics<parallel>], iteration_bounds = array<i64: 1>, scalar_prefetch = 0 : i64, scratch_operands = 1 : i64, tpu.core_type = #tpu.core_type<tc>, window_params = [{transform_indices = @transform_0, window_bounds = array<i64: 8, 8, 32>}, {transform_indices = @transform_1, window_bounds = array<i64: 8, 8>}, {pipeline_mode = #tpu.pipeline_mode<synchronous>, transform_indices = @transform_2, window_bounds = array<i64: 8, 32>}, {pipeline_mode = #tpu.pipeline_mode<synchronous>, transform_indices = @transform_3, window_bounds = array<i64: 8, 1>}, {pipeline_mode = #tpu.pipeline_mode<synchronous>, transform_indices = @transform_4, window_bounds = array<i64: 8, 8>}, {pipeline_mode = #tpu.pipeline_mode<synchronous>, transform_indices = @transform_5, window_bounds = array<i64: 8, 1>}, {transform_indices = @transform_6, window_bounds = array<i64: 8, 8>}, {transform_indices = @transform_7, window_bounds = array<i64: 1, 8>}]} {
    %c0 = arith.constant 0 : index
    %c0_0 = arith.constant 0 : index
    %c0_1 = arith.constant 0 : index
    %0 = vector.load %arg1[%c0, %c0_0, %c0_1] : memref<8x8x32xf32, #tpu.memory_space<vmem>>, vector<8x8x32xf32>
    %1 = vector.shape_cast %0 : vector<8x8x32xf32> to vector<64x32xf32>
    %c0_2 = arith.constant 0 : index
    %c0_3 = arith.constant 0 : index
    %2 = vector.load %arg3[%c0_2, %c0_3] : memref<8x32xf32, #tpu.memory_space<vmem>>, vector<8x32xf32>
    %cst = arith.constant dense<0.000000e+00> : vector<8x64xf32>
    %3 = tpu.matmul %2, %1, %cst {dimension_numbers = #tpu.dot_dimension_numbers<[1], [1], [0], [0], [0, 0, 1, 0], [], []>} : vector<8x32xf32>, vector<64x32xf32>, vector<8x64xf32> -> vector<8x64xf32>
    %c0_4 = arith.constant 0 : index
    %c0_5 = arith.constant 0 : index
    %4 = vector.load %arg4[%c0_4, %c0_5] : memref<8x1xf32, #tpu.memory_space<vmem>>, vector<8x1xf32>
    %5 = vector.broadcast %4 : vector<8x1xf32> to vector<8x64xf32>
    %6 = arith.addf %3, %5 : vector<8x64xf32>
    %c0_6 = arith.constant 0 : index
    %c0_7 = arith.constant 0 : index
    %7 = vector.load %arg2[%c0_6, %c0_7] : memref<8x8xf32, #tpu.memory_space<vmem>>, vector<8x8xf32>
    %c0_8 = arith.constant 0 : index
    %c0_9 = arith.constant 0 : index
    %8 = vector.load %arg5[%c0_8, %c0_9] : memref<8x8xf32, #tpu.memory_space<vmem>>, vector<8x8xf32>
    %9 = tpu.iota {dimensions = array<i32: 0>} : vector<8x8xi32>
    %10 = vector.extract_strided_slice %8 {offsets = [0, 0], sizes = [8, 1], strides = [1, 1]} : vector<8x8xf32> to vector<8x1xf32>
    %11 = vector.shape_cast %10 : vector<8x1xf32> to vector<8x1xf32>
    %12 = vector.broadcast %11 : vector<8x1xf32> to vector<8x8xf32>
    %13 = vector.extract_strided_slice %8 {offsets = [0, 1], sizes = [8, 1], strides = [1, 1]} : vector<8x8xf32> to vector<8x1xf32>
    %14 = vector.shape_cast %13 : vector<8x1xf32> to vector<8x1xf32>
    %15 = vector.broadcast %14 : vector<8x1xf32> to vector<8x8xf32>
    %16 = vector.extract_strided_slice %8 {offsets = [0, 2], sizes = [8, 1], strides = [1, 1]} : vector<8x8xf32> to vector<8x1xf32>
    %17 = vector.shape_cast %16 : vector<8x1xf32> to vector<8x1xf32>
    %18 = vector.broadcast %17 : vector<8x1xf32> to vector<8x8xf32>
    %19 = vector.extract_strided_slice %8 {offsets = [0, 3], sizes = [8, 1], strides = [1, 1]} : vector<8x8xf32> to vector<8x1xf32>
    %20 = vector.shape_cast %19 : vector<8x1xf32> to vector<8x1xf32>
    %21 = vector.broadcast %20 : vector<8x1xf32> to vector<8x8xf32>
    %22 = vector.extract_strided_slice %8 {offsets = [0, 4], sizes = [8, 1], strides = [1, 1]} : vector<8x8xf32> to vector<8x1xf32>
    %23 = vector.shape_cast %22 : vector<8x1xf32> to vector<8x1xf32>
    %24 = vector.broadcast %23 : vector<8x1xf32> to vector<8x8xf32>
    %25 = vector.extract_strided_slice %8 {offsets = [0, 5], sizes = [8, 1], strides = [1, 1]} : vector<8x8xf32> to vector<8x1xf32>
    %26 = vector.shape_cast %25 : vector<8x1xf32> to vector<8x1xf32>
    %27 = vector.broadcast %26 : vector<8x1xf32> to vector<8x8xf32>
    %28 = vector.extract_strided_slice %8 {offsets = [0, 6], sizes = [8, 1], strides = [1, 1]} : vector<8x8xf32> to vector<8x1xf32>
    %29 = vector.shape_cast %28 : vector<8x1xf32> to vector<8x1xf32>
    %30 = vector.broadcast %29 : vector<8x1xf32> to vector<8x8xf32>
    %31 = vector.extract_strided_slice %8 {offsets = [0, 7], sizes = [8, 1], strides = [1, 1]} : vector<8x8xf32> to vector<8x1xf32>
    %32 = vector.shape_cast %31 : vector<8x1xf32> to vector<8x1xf32>
    %33 = vector.broadcast %32 : vector<8x1xf32> to vector<8x8xf32>
    %c6_i32 = arith.constant 6 : i32
    %34 = vector.broadcast %c6_i32 : i32 to vector<8x8xi32>
    %35 = arith.cmpi eq, %9, %34 : vector<8x8xi32>
    %cst_10 = arith.constant 0.000000e+00 : f32
    %cst_11 = arith.constant -1.000000e+04 : f32
    %36 = vector.broadcast %cst_10 : f32 to vector<8x8xf32>
    %37 = vector.broadcast %cst_11 : f32 to vector<8x8xf32>
    %38 = arith.select %35, %36, %37 : vector<8x8xi1>, vector<8x8xf32>
    %39 = vector.extract_strided_slice %38 {offsets = [0, 0], sizes = [1, 8], strides = [1, 1]} : vector<8x8xf32> to vector<1x8xf32>
    %40 = vector.broadcast %39 : vector<1x8xf32> to vector<8x8xf32>
    %41 = arith.addf %40, %12 : vector<8x8xf32>
    %c0_i32 = arith.constant 0 : i32
    %42 = vector.broadcast %c0_i32 : i32 to vector<8x8xi32>
    %43 = vector.extract_strided_slice %38 {offsets = [1, 0], sizes = [1, 8], strides = [1, 1]} : vector<8x8xf32> to vector<1x8xf32>
    %44 = vector.broadcast %43 : vector<1x8xf32> to vector<8x8xf32>
    %45 = arith.addf %44, %15 : vector<8x8xf32>
    %46 = arith.cmpf ogt, %45, %41 : vector<8x8xf32>
    %47 = arith.select %46, %45, %41 : vector<8x8xi1>, vector<8x8xf32>
    %c1_i32 = arith.constant 1 : i32
    %48 = vector.broadcast %c1_i32 : i32 to vector<8x8xi32>
    %49 = arith.select %46, %48, %42 : vector<8x8xi1>, vector<8x8xi32>
    %50 = vector.extract_strided_slice %38 {offsets = [2, 0], sizes = [1, 8], strides = [1, 1]} : vector<8x8xf32> to vector<1x8xf32>
    %51 = vector.broadcast %50 : vector<1x8xf32> to vector<8x8xf32>
    %52 = arith.addf %51, %18 : vector<8x8xf32>
    %53 = arith.cmpf ogt, %52, %47 : vector<8x8xf32>
    %54 = arith.select %53, %52, %47 : vector<8x8xi1>, vector<8x8xf32>
    %c2_i32 = arith.constant 2 : i32
    %55 = vector.broadcast %c2_i32 : i32 to vector<8x8xi32>
    %56 = arith.select %53, %55, %49 : vector<8x8xi1>, vector<8x8xi32>
    %57 = vector.extract_strided_slice %38 {offsets = [3, 0], sizes = [1, 8], strides = [1, 1]} : vector<8x8xf32> to vector<1x8xf32>
    %58 = vector.broadcast %57 : vector<1x8xf32> to vector<8x8xf32>
    %59 = arith.addf %58, %21 : vector<8x8xf32>
    %60 = arith.cmpf ogt, %59, %54 : vector<8x8xf32>
    %61 = arith.select %60, %59, %54 : vector<8x8xi1>, vector<8x8xf32>
    %c3_i32 = arith.constant 3 : i32
    %62 = vector.broadcast %c3_i32 : i32 to vector<8x8xi32>
    %63 = arith.select %60, %62, %56 : vector<8x8xi1>, vector<8x8xi32>
    %64 = vector.extract_strided_slice %38 {offsets = [4, 0], sizes = [1, 8], strides = [1, 1]} : vector<8x8xf32> to vector<1x8xf32>
    %65 = vector.broadcast %64 : vector<1x8xf32> to vector<8x8xf32>
    %66 = arith.addf %65, %24 : vector<8x8xf32>
    %67 = arith.cmpf ogt, %66, %61 : vector<8x8xf32>
    %68 = arith.select %67, %66, %61 : vector<8x8xi1>, vector<8x8xf32>
    %c4_i32 = arith.constant 4 : i32
    %69 = vector.broadcast %c4_i32 : i32 to vector<8x8xi32>
    %70 = arith.select %67, %69, %63 : vector<8x8xi1>, vector<8x8xi32>
    %71 = vector.extract_strided_slice %38 {offsets = [5, 0], sizes = [1, 8], strides = [1, 1]} : vector<8x8xf32> to vector<1x8xf32>
    %72 = vector.broadcast %71 : vector<1x8xf32> to vector<8x8xf32>
    %73 = arith.addf %72, %27 : vector<8x8xf32>
    %74 = arith.cmpf ogt, %73, %68 : vector<8x8xf32>
    %75 = arith.select %74, %73, %68 : vector<8x8xi1>, vector<8x8xf32>
    %c5_i32 = arith.constant 5 : i32
    %76 = vector.broadcast %c5_i32 : i32 to vector<8x8xi32>
    %77 = arith.select %74, %76, %70 : vector<8x8xi1>, vector<8x8xi32>
    %78 = vector.extract_strided_slice %38 {offsets = [6, 0], sizes = [1, 8], strides = [1, 1]} : vector<8x8xf32> to vector<1x8xf32>
    %79 = vector.broadcast %78 : vector<1x8xf32> to vector<8x8xf32>
    %80 = arith.addf %79, %30 : vector<8x8xf32>
    %81 = arith.cmpf ogt, %80, %75 : vector<8x8xf32>
    %82 = arith.select %81, %80, %75 : vector<8x8xi1>, vector<8x8xf32>
    %c6_i32_12 = arith.constant 6 : i32
    %83 = vector.broadcast %c6_i32_12 : i32 to vector<8x8xi32>
    %84 = arith.select %81, %83, %77 : vector<8x8xi1>, vector<8x8xi32>
    %85 = vector.extract_strided_slice %38 {offsets = [7, 0], sizes = [1, 8], strides = [1, 1]} : vector<8x8xf32> to vector<1x8xf32>
    %86 = vector.broadcast %85 : vector<1x8xf32> to vector<8x8xf32>
    %87 = arith.addf %86, %33 : vector<8x8xf32>
    %88 = arith.cmpf ogt, %87, %82 : vector<8x8xf32>
    %89 = arith.select %88, %87, %82 : vector<8x8xi1>, vector<8x8xf32>
    %c7_i32 = arith.constant 7 : i32
    %90 = vector.broadcast %c7_i32 : i32 to vector<8x8xi32>
    %91 = arith.select %88, %90, %84 : vector<8x8xi1>, vector<8x8xi32>
    %c0_13 = arith.constant 0 : index
    %c0_14 = arith.constant 0 : index
    %c0_15 = arith.constant 0 : index
    %92 = vector.load %arg9[%c0_13, %c0_14, %c0_15] : memref<8x8x8xi32, #tpu.memory_space<vmem>>, vector<1x8x8xi32>
    %93 = vector.shape_cast %92 : vector<1x8x8xi32> to vector<8x8xi32>
    %94 = vector.shape_cast %91 : vector<8x8xi32> to vector<1x8x8xi32>
    tpu.vector_store %arg9[%c0_13, %c0_14, %c0_15], %94 {strides = array<i32>} : memref<8x8x8xi32, #tpu.memory_space<vmem>>, vector<1x8x8xi32>,
    %95 = vector.extract_strided_slice %6 {offsets = [0, 0], sizes = [8, 8], strides = [1, 1]} : vector<8x64xf32> to vector<8x8xf32>
    %96 = arith.addf %89, %95 : vector<8x8xf32>
    %97 = vector.extract_strided_slice %7 {offsets = [0, 0], sizes = [1, 8], strides = [1, 1]} : vector<8x8xf32> to vector<1x8xf32>
    %cst_16 = arith.constant 0.000000e+00 : f32
    %98 = vector.broadcast %cst_16 : f32 to vector<1x8xf32>
    %99 = arith.cmpf ogt, %97, %98 : vector<1x8xf32>
    %100 = vector.shape_cast %99 : vector<1x8xi1> to vector<1x8xi1>
    %101 = vector.broadcast %100 : vector<1x8xi1> to vector<8x8xi1>
    %102 = arith.select %101, %96, %38 : vector<8x8xi1>, vector<8x8xf32>
    %103 = vector.extract_strided_slice %102 {offsets = [0, 0], sizes = [1, 8], strides = [1, 1]} : vector<8x8xf32> to vector<1x8xf32>
    %104 = vector.broadcast %103 : vector<1x8xf32> to vector<8x8xf32>
    %105 = arith.addf %104, %12 : vector<8x8xf32>
    %c0_i32_17 = arith.constant 0 : i32
    %106 = vector.broadcast %c0_i32_17 : i32 to vector<8x8xi32>
    %107 = vector.extract_strided_slice %102 {offsets = [1, 0], sizes = [1, 8], strides = [1, 1]} : vector<8x8xf32> to vector<1x8xf32>
    %108 = vector.broadcast %107 : vector<1x8xf32> to vector<8x8xf32>
    %109 = arith.addf %108, %15 : vector<8x8xf32>
    %110 = arith.cmpf ogt, %109, %105 : vector<8x8xf32>
    %111 = arith.select %110, %109, %105 : vector<8x8xi1>, vector<8x8xf32>
    %c1_i32_18 = arith.constant 1 : i32
    %112 = vector.broadcast %c1_i32_18 : i32 to vector<8x8xi32>
    %113 = arith.select %110, %112, %106 : vector<8x8xi1>, vector<8x8xi32>
    %114 = vector.extract_strided_slice %102 {offsets = [2, 0], sizes = [1, 8], strides = [1, 1]} : vector<8x8xf32> to vector<1x8xf32>
    %115 = vector.broadcast %114 : vector<1x8xf32> to vector<8x8xf32>
    %116 = arith.addf %115, %18 : vector<8x8xf32>
    %117 = arith.cmpf ogt, %116, %111 : vector<8x8xf32>
    %118 = arith.select %117, %116, %111 : vector<8x8xi1>, vector<8x8xf32>
    %c2_i32_19 = arith.constant 2 : i32
    %119 = vector.broadcast %c2_i32_19 : i32 to vector<8x8xi32>
    %120 = arith.select %117, %119, %113 : vector<8x8xi1>, vector<8x8xi32>
    %121 = vector.extract_strided_slice %102 {offsets = [3, 0], sizes = [1, 8], strides = [1, 1]} : vector<8x8xf32> to vector<1x8xf32>
    %122 = vector.broadcast %121 : vector<1x8xf32> to vector<8x8xf32>
    %123 = arith.addf %122, %21 : vector<8x8xf32>
    %124 = arith.cmpf ogt, %123, %118 : vector<8x8xf32>
    %125 = arith.select %124, %123, %118 : vector<8x8xi1>, vector<8x8xf32>
    %c3_i32_20 = arith.constant 3 : i32
    %126 = vector.broadcast %c3_i32_20 : i32 to vector<8x8xi32>
    %127 = arith.select %124, %126, %120 : vector<8x8xi1>, vector<8x8xi32>
    %128 = vector.extract_strided_slice %102 {offsets = [4, 0], sizes = [1, 8], strides = [1, 1]} : vector<8x8xf32> to vector<1x8xf32>
    %129 = vector.broadcast %128 : vector<1x8xf32> to vector<8x8xf32>
    %130 = arith.addf %129, %24 : vector<8x8xf32>
    %131 = arith.cmpf ogt, %130, %125 : vector<8x8xf32>
    %132 = arith.select %131, %130, %125 : vector<8x8xi1>, vector<8x8xf32>
    %c4_i32_21 = arith.constant 4 : i32
    %133 = vector.broadcast %c4_i32_21 : i32 to vector<8x8xi32>
    %134 = arith.select %131, %133, %127 : vector<8x8xi1>, vector<8x8xi32>
    %135 = vector.extract_strided_slice %102 {offsets = [5, 0], sizes = [1, 8], strides = [1, 1]} : vector<8x8xf32> to vector<1x8xf32>
    %136 = vector.broadcast %135 : vector<1x8xf32> to vector<8x8xf32>
    %137 = arith.addf %136, %27 : vector<8x8xf32>
    %138 = arith.cmpf ogt, %137, %132 : vector<8x8xf32>
    %139 = arith.select %138, %137, %132 : vector<8x8xi1>, vector<8x8xf32>
    %c5_i32_22 = arith.constant 5 : i32
    %140 = vector.broadcast %c5_i32_22 : i32 to vector<8x8xi32>
    %141 = arith.select %138, %140, %134 : vector<8x8xi1>, vector<8x8xi32>
    %142 = vector.extract_strided_slice %102 {offsets = [6, 0], sizes = [1, 8], strides = [1, 1]} : vector<8x8xf32> to vector<1x8xf32>
    %143 = vector.broadcast %142 : vector<1x8xf32> to vector<8x8xf32>
    %144 = arith.addf %143, %30 : vector<8x8xf32>
    %145 = arith.cmpf ogt, %144, %139 : vector<8x8xf32>
    %146 = arith.select %145, %144, %139 : vector<8x8xi1>, vector<8x8xf32>
    %c6_i32_23 = arith.constant 6 : i32
    %147 = vector.broadcast %c6_i32_23 : i32 to vector<8x8xi32>
    %148 = arith.select %145, %147, %141 : vector<8x8xi1>, vector<8x8xi32>
    %149 = vector.extract_strided_slice %102 {offsets = [7, 0], sizes = [1, 8], strides = [1, 1]} : vector<8x8xf32> to vector<1x8xf32>
    %150 = vector.broadcast %149 : vector<1x8xf32> to vector<8x8xf32>
    %151 = arith.addf %150, %33 : vector<8x8xf32>
    %152 = arith.cmpf ogt, %151, %146 : vector<8x8xf32>
    %153 = arith.select %152, %151, %146 : vector<8x8xi1>, vector<8x8xf32>
    %c7_i32_24 = arith.constant 7 : i32
    %154 = vector.broadcast %c7_i32_24 : i32 to vector<8x8xi32>
    %155 = arith.select %152, %154, %148 : vector<8x8xi1>, vector<8x8xi32>
    %c1 = arith.constant 1 : index
    %c0_25 = arith.constant 0 : index
    %c0_26 = arith.constant 0 : index
    %156 = vector.load %arg9[%c1, %c0_25, %c0_26] : memref<8x8x8xi32, #tpu.memory_space<vmem>>, vector<1x8x8xi32>
    %157 = vector.shape_cast %156 : vector<1x8x8xi32> to vector<8x8xi32>
    %158 = vector.shape_cast %155 : vector<8x8xi32> to vector<1x8x8xi32>
    tpu.vector_store %arg9[%c1, %c0_25, %c0_26], %158 {strides = array<i32>} : memref<8x8x8xi32, #tpu.memory_space<vmem>>, vector<1x8x8xi32>,
    %159 = vector.extract_strided_slice %6 {offsets = [0, 8], sizes = [8, 8], strides = [1, 1]} : vector<8x64xf32> to vector<8x8xf32>
    %160 = arith.addf %153, %159 : vector<8x8xf32>
    %161 = vector.extract_strided_slice %7 {offsets = [1, 0], sizes = [1, 8], strides = [1, 1]} : vector<8x8xf32> to vector<1x8xf32>
    %cst_27 = arith.constant 0.000000e+00 : f32
    %162 = vector.broadcast %cst_27 : f32 to vector<1x8xf32>
    %163 = arith.cmpf ogt, %161, %162 : vector<1x8xf32>
    %164 = vector.shape_cast %163 : vector<1x8xi1> to vector<1x8xi1>
    %165 = vector.broadcast %164 : vector<1x8xi1> to vector<8x8xi1>
    %166 = arith.select %165, %160, %102 : vector<8x8xi1>, vector<8x8xf32>
    %167 = vector.extract_strided_slice %166 {offsets = [0, 0], sizes = [1, 8], strides = [1, 1]} : vector<8x8xf32> to vector<1x8xf32>
    %168 = vector.broadcast %167 : vector<1x8xf32> to vector<8x8xf32>
    %169 = arith.addf %168, %12 : vector<8x8xf32>
    %c0_i32_28 = arith.constant 0 : i32
    %170 = vector.broadcast %c0_i32_28 : i32 to vector<8x8xi32>
    %171 = vector.extract_strided_slice %166 {offsets = [1, 0], sizes = [1, 8], strides = [1, 1]} : vector<8x8xf32> to vector<1x8xf32>
    %172 = vector.broadcast %171 : vector<1x8xf32> to vector<8x8xf32>
    %173 = arith.addf %172, %15 : vector<8x8xf32>
    %174 = arith.cmpf ogt, %173, %169 : vector<8x8xf32>
    %175 = arith.select %174, %173, %169 : vector<8x8xi1>, vector<8x8xf32>
    %c1_i32_29 = arith.constant 1 : i32
    %176 = vector.broadcast %c1_i32_29 : i32 to vector<8x8xi32>
    %177 = arith.select %174, %176, %170 : vector<8x8xi1>, vector<8x8xi32>
    %178 = vector.extract_strided_slice %166 {offsets = [2, 0], sizes = [1, 8], strides = [1, 1]} : vector<8x8xf32> to vector<1x8xf32>
    %179 = vector.broadcast %178 : vector<1x8xf32> to vector<8x8xf32>
    %180 = arith.addf %179, %18 : vector<8x8xf32>
    %181 = arith.cmpf ogt, %180, %175 : vector<8x8xf32>
    %182 = arith.select %181, %180, %175 : vector<8x8xi1>, vector<8x8xf32>
    %c2_i32_30 = arith.constant 2 : i32
    %183 = vector.broadcast %c2_i32_30 : i32 to vector<8x8xi32>
    %184 = arith.select %181, %183, %177 : vector<8x8xi1>, vector<8x8xi32>
    %185 = vector.extract_strided_slice %166 {offsets = [3, 0], sizes = [1, 8], strides = [1, 1]} : vector<8x8xf32> to vector<1x8xf32>
    %186 = vector.broadcast %185 : vector<1x8xf32> to vector<8x8xf32>
    %187 = arith.addf %186, %21 : vector<8x8xf32>
    %188 = arith.cmpf ogt, %187, %182 : vector<8x8xf32>
    %189 = arith.select %188, %187, %182 : vector<8x8xi1>, vector<8x8xf32>
    %c3_i32_31 = arith.constant 3 : i32
    %190 = vector.broadcast %c3_i32_31 : i32 to vector<8x8xi32>
    %191 = arith.select %188, %190, %184 : vector<8x8xi1>, vector<8x8xi32>
    %192 = vector.extract_strided_slice %166 {offsets = [4, 0], sizes = [1, 8], strides = [1, 1]} : vector<8x8xf32> to vector<1x8xf32>
    %193 = vector.broadcast %192 : vector<1x8xf32> to vector<8x8xf32>
    %194 = arith.addf %193, %24 : vector<8x8xf32>
    %195 = arith.cmpf ogt, %194, %189 : vector<8x8xf32>
    %196 = arith.select %195, %194, %189 : vector<8x8xi1>, vector<8x8xf32>
    %c4_i32_32 = arith.constant 4 : i32
    %197 = vector.broadcast %c4_i32_32 : i32 to vector<8x8xi32>
    %198 = arith.select %195, %197, %191 : vector<8x8xi1>, vector<8x8xi32>
    %199 = vector.extract_strided_slice %166 {offsets = [5, 0], sizes = [1, 8], strides = [1, 1]} : vector<8x8xf32> to vector<1x8xf32>
    %200 = vector.broadcast %199 : vector<1x8xf32> to vector<8x8xf32>
    %201 = arith.addf %200, %27 : vector<8x8xf32>
    %202 = arith.cmpf ogt, %201, %196 : vector<8x8xf32>
    %203 = arith.select %202, %201, %196 : vector<8x8xi1>, vector<8x8xf32>
    %c5_i32_33 = arith.constant 5 : i32
    %204 = vector.broadcast %c5_i32_33 : i32 to vector<8x8xi32>
    %205 = arith.select %202, %204, %198 : vector<8x8xi1>, vector<8x8xi32>
    %206 = vector.extract_strided_slice %166 {offsets = [6, 0], sizes = [1, 8], strides = [1, 1]} : vector<8x8xf32> to vector<1x8xf32>
    %207 = vector.broadcast %206 : vector<1x8xf32> to vector<8x8xf32>
    %208 = arith.addf %207, %30 : vector<8x8xf32>
    %209 = arith.cmpf ogt, %208, %203 : vector<8x8xf32>
    %210 = arith.select %209, %208, %203 : vector<8x8xi1>, vector<8x8xf32>
    %c6_i32_34 = arith.constant 6 : i32
    %211 = vector.broadcast %c6_i32_34 : i32 to vector<8x8xi32>
    %212 = arith.select %209, %211, %205 : vector<8x8xi1>, vector<8x8xi32>
    %213 = vector.extract_strided_slice %166 {offsets = [7, 0], sizes = [1, 8], strides = [1, 1]} : vector<8x8xf32> to vector<1x8xf32>
    %214 = vector.broadcast %213 : vector<1x8xf32> to vector<8x8xf32>
    %215 = arith.addf %214, %33 : vector<8x8xf32>
    %216 = arith.cmpf ogt, %215, %210 : vector<8x8xf32>
    %217 = arith.select %216, %215, %210 : vector<8x8xi1>, vector<8x8xf32>
    %c7_i32_35 = arith.constant 7 : i32
    %218 = vector.broadcast %c7_i32_35 : i32 to vector<8x8xi32>
    %219 = arith.select %216, %218, %212 : vector<8x8xi1>, vector<8x8xi32>
    %c2 = arith.constant 2 : index
    %c0_36 = arith.constant 0 : index
    %c0_37 = arith.constant 0 : index
    %220 = vector.load %arg9[%c2, %c0_36, %c0_37] : memref<8x8x8xi32, #tpu.memory_space<vmem>>, vector<1x8x8xi32>
    %221 = vector.shape_cast %220 : vector<1x8x8xi32> to vector<8x8xi32>
    %222 = vector.shape_cast %219 : vector<8x8xi32> to vector<1x8x8xi32>
    tpu.vector_store %arg9[%c2, %c0_36, %c0_37], %222 {strides = array<i32>} : memref<8x8x8xi32, #tpu.memory_space<vmem>>, vector<1x8x8xi32>,
    %223 = vector.extract_strided_slice %6 {offsets = [0, 16], sizes = [8, 8], strides = [1, 1]} : vector<8x64xf32> to vector<8x8xf32>
    %224 = arith.addf %217, %223 : vector<8x8xf32>
    %225 = vector.extract_strided_slice %7 {offsets = [2, 0], sizes = [1, 8], strides = [1, 1]} : vector<8x8xf32> to vector<1x8xf32>
    %cst_38 = arith.constant 0.000000e+00 : f32
    %226 = vector.broadcast %cst_38 : f32 to vector<1x8xf32>
    %227 = arith.cmpf ogt, %225, %226 : vector<1x8xf32>
    %228 = vector.shape_cast %227 : vector<1x8xi1> to vector<1x8xi1>
    %229 = vector.broadcast %228 : vector<1x8xi1> to vector<8x8xi1>
    %230 = arith.select %229, %224, %166 : vector<8x8xi1>, vector<8x8xf32>
    %231 = vector.extract_strided_slice %230 {offsets = [0, 0], sizes = [1, 8], strides = [1, 1]} : vector<8x8xf32> to vector<1x8xf32>
    %232 = vector.broadcast %231 : vector<1x8xf32> to vector<8x8xf32>
    %233 = arith.addf %232, %12 : vector<8x8xf32>
    %c0_i32_39 = arith.constant 0 : i32
    %234 = vector.broadcast %c0_i32_39 : i32 to vector<8x8xi32>
    %235 = vector.extract_strided_slice %230 {offsets = [1, 0], sizes = [1, 8], strides = [1, 1]} : vector<8x8xf32> to vector<1x8xf32>
    %236 = vector.broadcast %235 : vector<1x8xf32> to vector<8x8xf32>
    %237 = arith.addf %236, %15 : vector<8x8xf32>
    %238 = arith.cmpf ogt, %237, %233 : vector<8x8xf32>
    %239 = arith.select %238, %237, %233 : vector<8x8xi1>, vector<8x8xf32>
    %c1_i32_40 = arith.constant 1 : i32
    %240 = vector.broadcast %c1_i32_40 : i32 to vector<8x8xi32>
    %241 = arith.select %238, %240, %234 : vector<8x8xi1>, vector<8x8xi32>
    %242 = vector.extract_strided_slice %230 {offsets = [2, 0], sizes = [1, 8], strides = [1, 1]} : vector<8x8xf32> to vector<1x8xf32>
    %243 = vector.broadcast %242 : vector<1x8xf32> to vector<8x8xf32>
    %244 = arith.addf %243, %18 : vector<8x8xf32>
    %245 = arith.cmpf ogt, %244, %239 : vector<8x8xf32>
    %246 = arith.select %245, %244, %239 : vector<8x8xi1>, vector<8x8xf32>
    %c2_i32_41 = arith.constant 2 : i32
    %247 = vector.broadcast %c2_i32_41 : i32 to vector<8x8xi32>
    %248 = arith.select %245, %247, %241 : vector<8x8xi1>, vector<8x8xi32>
    %249 = vector.extract_strided_slice %230 {offsets = [3, 0], sizes = [1, 8], strides = [1, 1]} : vector<8x8xf32> to vector<1x8xf32>
    %250 = vector.broadcast %249 : vector<1x8xf32> to vector<8x8xf32>
    %251 = arith.addf %250, %21 : vector<8x8xf32>
    %252 = arith.cmpf ogt, %251, %246 : vector<8x8xf32>
    %253 = arith.select %252, %251, %246 : vector<8x8xi1>, vector<8x8xf32>
    %c3_i32_42 = arith.constant 3 : i32
    %254 = vector.broadcast %c3_i32_42 : i32 to vector<8x8xi32>
    %255 = arith.select %252, %254, %248 : vector<8x8xi1>, vector<8x8xi32>
    %256 = vector.extract_strided_slice %230 {offsets = [4, 0], sizes = [1, 8], strides = [1, 1]} : vector<8x8xf32> to vector<1x8xf32>
    %257 = vector.broadcast %256 : vector<1x8xf32> to vector<8x8xf32>
    %258 = arith.addf %257, %24 : vector<8x8xf32>
    %259 = arith.cmpf ogt, %258, %253 : vector<8x8xf32>
    %260 = arith.select %259, %258, %253 : vector<8x8xi1>, vector<8x8xf32>
    %c4_i32_43 = arith.constant 4 : i32
    %261 = vector.broadcast %c4_i32_43 : i32 to vector<8x8xi32>
    %262 = arith.select %259, %261, %255 : vector<8x8xi1>, vector<8x8xi32>
    %263 = vector.extract_strided_slice %230 {offsets = [5, 0], sizes = [1, 8], strides = [1, 1]} : vector<8x8xf32> to vector<1x8xf32>
    %264 = vector.broadcast %263 : vector<1x8xf32> to vector<8x8xf32>
    %265 = arith.addf %264, %27 : vector<8x8xf32>
    %266 = arith.cmpf ogt, %265, %260 : vector<8x8xf32>
    %267 = arith.select %266, %265, %260 : vector<8x8xi1>, vector<8x8xf32>
    %c5_i32_44 = arith.constant 5 : i32
    %268 = vector.broadcast %c5_i32_44 : i32 to vector<8x8xi32>
    %269 = arith.select %266, %268, %262 : vector<8x8xi1>, vector<8x8xi32>
    %270 = vector.extract_strided_slice %230 {offsets = [6, 0], sizes = [1, 8], strides = [1, 1]} : vector<8x8xf32> to vector<1x8xf32>
    %271 = vector.broadcast %270 : vector<1x8xf32> to vector<8x8xf32>
    %272 = arith.addf %271, %30 : vector<8x8xf32>
    %273 = arith.cmpf ogt, %272, %267 : vector<8x8xf32>
    %274 = arith.select %273, %272, %267 : vector<8x8xi1>, vector<8x8xf32>
    %c6_i32_45 = arith.constant 6 : i32
    %275 = vector.broadcast %c6_i32_45 : i32 to vector<8x8xi32>
    %276 = arith.select %273, %275, %269 : vector<8x8xi1>, vector<8x8xi32>
    %277 = vector.extract_strided_slice %230 {offsets = [7, 0], sizes = [1, 8], strides = [1, 1]} : vector<8x8xf32> to vector<1x8xf32>
    %278 = vector.broadcast %277 : vector<1x8xf32> to vector<8x8xf32>
    %279 = arith.addf %278, %33 : vector<8x8xf32>
    %280 = arith.cmpf ogt, %279, %274 : vector<8x8xf32>
    %281 = arith.select %280, %279, %274 : vector<8x8xi1>, vector<8x8xf32>
    %c7_i32_46 = arith.constant 7 : i32
    %282 = vector.broadcast %c7_i32_46 : i32 to vector<8x8xi32>
    %283 = arith.select %280, %282, %276 : vector<8x8xi1>, vector<8x8xi32>
    %c3 = arith.constant 3 : index
    %c0_47 = arith.constant 0 : index
    %c0_48 = arith.constant 0 : index
    %284 = vector.load %arg9[%c3, %c0_47, %c0_48] : memref<8x8x8xi32, #tpu.memory_space<vmem>>, vector<1x8x8xi32>
    %285 = vector.shape_cast %284 : vector<1x8x8xi32> to vector<8x8xi32>
    %286 = vector.shape_cast %283 : vector<8x8xi32> to vector<1x8x8xi32>
    tpu.vector_store %arg9[%c3, %c0_47, %c0_48], %286 {strides = array<i32>} : memref<8x8x8xi32, #tpu.memory_space<vmem>>, vector<1x8x8xi32>,
    %287 = vector.extract_strided_slice %6 {offsets = [0, 24], sizes = [8, 8], strides = [1, 1]} : vector<8x64xf32> to vector<8x8xf32>
    %288 = arith.addf %281, %287 : vector<8x8xf32>
    %289 = vector.extract_strided_slice %7 {offsets = [3, 0], sizes = [1, 8], strides = [1, 1]} : vector<8x8xf32> to vector<1x8xf32>
    %cst_49 = arith.constant 0.000000e+00 : f32
    %290 = vector.broadcast %cst_49 : f32 to vector<1x8xf32>
    %291 = arith.cmpf ogt, %289, %290 : vector<1x8xf32>
    %292 = vector.shape_cast %291 : vector<1x8xi1> to vector<1x8xi1>
    %293 = vector.broadcast %292 : vector<1x8xi1> to vector<8x8xi1>
    %294 = arith.select %293, %288, %230 : vector<8x8xi1>, vector<8x8xf32>
    %295 = vector.extract_strided_slice %294 {offsets = [0, 0], sizes = [1, 8], strides = [1, 1]} : vector<8x8xf32> to vector<1x8xf32>
    %296 = vector.broadcast %295 : vector<1x8xf32> to vector<8x8xf32>
    %297 = arith.addf %296, %12 : vector<8x8xf32>
    %c0_i32_50 = arith.constant 0 : i32
    %298 = vector.broadcast %c0_i32_50 : i32 to vector<8x8xi32>
    %299 = vector.extract_strided_slice %294 {offsets = [1, 0], sizes = [1, 8], strides = [1, 1]} : vector<8x8xf32> to vector<1x8xf32>
    %300 = vector.broadcast %299 : vector<1x8xf32> to vector<8x8xf32>
    %301 = arith.addf %300, %15 : vector<8x8xf32>
    %302 = arith.cmpf ogt, %301, %297 : vector<8x8xf32>
    %303 = arith.select %302, %301, %297 : vector<8x8xi1>, vector<8x8xf32>
    %c1_i32_51 = arith.constant 1 : i32
    %304 = vector.broadcast %c1_i32_51 : i32 to vector<8x8xi32>
    %305 = arith.select %302, %304, %298 : vector<8x8xi1>, vector<8x8xi32>
    %306 = vector.extract_strided_slice %294 {offsets = [2, 0], sizes = [1, 8], strides = [1, 1]} : vector<8x8xf32> to vector<1x8xf32>
    %307 = vector.broadcast %306 : vector<1x8xf32> to vector<8x8xf32>
    %308 = arith.addf %307, %18 : vector<8x8xf32>
    %309 = arith.cmpf ogt, %308, %303 : vector<8x8xf32>
    %310 = arith.select %309, %308, %303 : vector<8x8xi1>, vector<8x8xf32>
    %c2_i32_52 = arith.constant 2 : i32
    %311 = vector.broadcast %c2_i32_52 : i32 to vector<8x8xi32>
    %312 = arith.select %309, %311, %305 : vector<8x8xi1>, vector<8x8xi32>
    %313 = vector.extract_strided_slice %294 {offsets = [3, 0], sizes = [1, 8], strides = [1, 1]} : vector<8x8xf32> to vector<1x8xf32>
    %314 = vector.broadcast %313 : vector<1x8xf32> to vector<8x8xf32>
    %315 = arith.addf %314, %21 : vector<8x8xf32>
    %316 = arith.cmpf ogt, %315, %310 : vector<8x8xf32>
    %317 = arith.select %316, %315, %310 : vector<8x8xi1>, vector<8x8xf32>
    %c3_i32_53 = arith.constant 3 : i32
    %318 = vector.broadcast %c3_i32_53 : i32 to vector<8x8xi32>
    %319 = arith.select %316, %318, %312 : vector<8x8xi1>, vector<8x8xi32>
    %320 = vector.extract_strided_slice %294 {offsets = [4, 0], sizes = [1, 8], strides = [1, 1]} : vector<8x8xf32> to vector<1x8xf32>
    %321 = vector.broadcast %320 : vector<1x8xf32> to vector<8x8xf32>
    %322 = arith.addf %321, %24 : vector<8x8xf32>
    %323 = arith.cmpf ogt, %322, %317 : vector<8x8xf32>
    %324 = arith.select %323, %322, %317 : vector<8x8xi1>, vector<8x8xf32>
    %c4_i32_54 = arith.constant 4 : i32
    %325 = vector.broadcast %c4_i32_54 : i32 to vector<8x8xi32>
    %326 = arith.select %323, %325, %319 : vector<8x8xi1>, vector<8x8xi32>
    %327 = vector.extract_strided_slice %294 {offsets = [5, 0], sizes = [1, 8], strides = [1, 1]} : vector<8x8xf32> to vector<1x8xf32>
    %328 = vector.broadcast %327 : vector<1x8xf32> to vector<8x8xf32>
    %329 = arith.addf %328, %27 : vector<8x8xf32>
    %330 = arith.cmpf ogt, %329, %324 : vector<8x8xf32>
    %331 = arith.select %330, %329, %324 : vector<8x8xi1>, vector<8x8xf32>
    %c5_i32_55 = arith.constant 5 : i32
    %332 = vector.broadcast %c5_i32_55 : i32 to vector<8x8xi32>
    %333 = arith.select %330, %332, %326 : vector<8x8xi1>, vector<8x8xi32>
    %334 = vector.extract_strided_slice %294 {offsets = [6, 0], sizes = [1, 8], strides = [1, 1]} : vector<8x8xf32> to vector<1x8xf32>
    %335 = vector.broadcast %334 : vector<1x8xf32> to vector<8x8xf32>
    %336 = arith.addf %335, %30 : vector<8x8xf32>
    %337 = arith.cmpf ogt, %336, %331 : vector<8x8xf32>
    %338 = arith.select %337, %336, %331 : vector<8x8xi1>, vector<8x8xf32>
    %c6_i32_56 = arith.constant 6 : i32
    %339 = vector.broadcast %c6_i32_56 : i32 to vector<8x8xi32>
    %340 = arith.select %337, %339, %333 : vector<8x8xi1>, vector<8x8xi32>
    %341 = vector.extract_strided_slice %294 {offsets = [7, 0], sizes = [1, 8], strides = [1, 1]} : vector<8x8xf32> to vector<1x8xf32>
    %342 = vector.broadcast %341 : vector<1x8xf32> to vector<8x8xf32>
    %343 = arith.addf %342, %33 : vector<8x8xf32>
    %344 = arith.cmpf ogt, %343, %338 : vector<8x8xf32>
    %345 = arith.select %344, %343, %338 : vector<8x8xi1>, vector<8x8xf32>
    %c7_i32_57 = arith.constant 7 : i32
    %346 = vector.broadcast %c7_i32_57 : i32 to vector<8x8xi32>
    %347 = arith.select %344, %346, %340 : vector<8x8xi1>, vector<8x8xi32>
    %c4 = arith.constant 4 : index
    %c0_58 = arith.constant 0 : index
    %c0_59 = arith.constant 0 : index
    %348 = vector.load %arg9[%c4, %c0_58, %c0_59] : memref<8x8x8xi32, #tpu.memory_space<vmem>>, vector<1x8x8xi32>
    %349 = vector.shape_cast %348 : vector<1x8x8xi32> to vector<8x8xi32>
    %350 = vector.shape_cast %347 : vector<8x8xi32> to vector<1x8x8xi32>
    tpu.vector_store %arg9[%c4, %c0_58, %c0_59], %350 {strides = array<i32>} : memref<8x8x8xi32, #tpu.memory_space<vmem>>, vector<1x8x8xi32>,
    %351 = vector.extract_strided_slice %6 {offsets = [0, 32], sizes = [8, 8], strides = [1, 1]} : vector<8x64xf32> to vector<8x8xf32>
    %352 = arith.addf %345, %351 : vector<8x8xf32>
    %353 = vector.extract_strided_slice %7 {offsets = [4, 0], sizes = [1, 8], strides = [1, 1]} : vector<8x8xf32> to vector<1x8xf32>
    %cst_60 = arith.constant 0.000000e+00 : f32
    %354 = vector.broadcast %cst_60 : f32 to vector<1x8xf32>
    %355 = arith.cmpf ogt, %353, %354 : vector<1x8xf32>
    %356 = vector.shape_cast %355 : vector<1x8xi1> to vector<1x8xi1>
    %357 = vector.broadcast %356 : vector<1x8xi1> to vector<8x8xi1>
    %358 = arith.select %357, %352, %294 : vector<8x8xi1>, vector<8x8xf32>
    %359 = vector.extract_strided_slice %358 {offsets = [0, 0], sizes = [1, 8], strides = [1, 1]} : vector<8x8xf32> to vector<1x8xf32>
    %360 = vector.broadcast %359 : vector<1x8xf32> to vector<8x8xf32>
    %361 = arith.addf %360, %12 : vector<8x8xf32>
    %c0_i32_61 = arith.constant 0 : i32
    %362 = vector.broadcast %c0_i32_61 : i32 to vector<8x8xi32>
    %363 = vector.extract_strided_slice %358 {offsets = [1, 0], sizes = [1, 8], strides = [1, 1]} : vector<8x8xf32> to vector<1x8xf32>
    %364 = vector.broadcast %363 : vector<1x8xf32> to vector<8x8xf32>
    %365 = arith.addf %364, %15 : vector<8x8xf32>
    %366 = arith.cmpf ogt, %365, %361 : vector<8x8xf32>
    %367 = arith.select %366, %365, %361 : vector<8x8xi1>, vector<8x8xf32>
    %c1_i32_62 = arith.constant 1 : i32
    %368 = vector.broadcast %c1_i32_62 : i32 to vector<8x8xi32>
    %369 = arith.select %366, %368, %362 : vector<8x8xi1>, vector<8x8xi32>
    %370 = vector.extract_strided_slice %358 {offsets = [2, 0], sizes = [1, 8], strides = [1, 1]} : vector<8x8xf32> to vector<1x8xf32>
    %371 = vector.broadcast %370 : vector<1x8xf32> to vector<8x8xf32>
    %372 = arith.addf %371, %18 : vector<8x8xf32>
    %373 = arith.cmpf ogt, %372, %367 : vector<8x8xf32>
    %374 = arith.select %373, %372, %367 : vector<8x8xi1>, vector<8x8xf32>
    %c2_i32_63 = arith.constant 2 : i32
    %375 = vector.broadcast %c2_i32_63 : i32 to vector<8x8xi32>
    %376 = arith.select %373, %375, %369 : vector<8x8xi1>, vector<8x8xi32>
    %377 = vector.extract_strided_slice %358 {offsets = [3, 0], sizes = [1, 8], strides = [1, 1]} : vector<8x8xf32> to vector<1x8xf32>
    %378 = vector.broadcast %377 : vector<1x8xf32> to vector<8x8xf32>
    %379 = arith.addf %378, %21 : vector<8x8xf32>
    %380 = arith.cmpf ogt, %379, %374 : vector<8x8xf32>
    %381 = arith.select %380, %379, %374 : vector<8x8xi1>, vector<8x8xf32>
    %c3_i32_64 = arith.constant 3 : i32
    %382 = vector.broadcast %c3_i32_64 : i32 to vector<8x8xi32>
    %383 = arith.select %380, %382, %376 : vector<8x8xi1>, vector<8x8xi32>
    %384 = vector.extract_strided_slice %358 {offsets = [4, 0], sizes = [1, 8], strides = [1, 1]} : vector<8x8xf32> to vector<1x8xf32>
    %385 = vector.broadcast %384 : vector<1x8xf32> to vector<8x8xf32>
    %386 = arith.addf %385, %24 : vector<8x8xf32>
    %387 = arith.cmpf ogt, %386, %381 : vector<8x8xf32>
    %388 = arith.select %387, %386, %381 : vector<8x8xi1>, vector<8x8xf32>
    %c4_i32_65 = arith.constant 4 : i32
    %389 = vector.broadcast %c4_i32_65 : i32 to vector<8x8xi32>
    %390 = arith.select %387, %389, %383 : vector<8x8xi1>, vector<8x8xi32>
    %391 = vector.extract_strided_slice %358 {offsets = [5, 0], sizes = [1, 8], strides = [1, 1]} : vector<8x8xf32> to vector<1x8xf32>
    %392 = vector.broadcast %391 : vector<1x8xf32> to vector<8x8xf32>
    %393 = arith.addf %392, %27 : vector<8x8xf32>
    %394 = arith.cmpf ogt, %393, %388 : vector<8x8xf32>
    %395 = arith.select %394, %393, %388 : vector<8x8xi1>, vector<8x8xf32>
    %c5_i32_66 = arith.constant 5 : i32
    %396 = vector.broadcast %c5_i32_66 : i32 to vector<8x8xi32>
    %397 = arith.select %394, %396, %390 : vector<8x8xi1>, vector<8x8xi32>
    %398 = vector.extract_strided_slice %358 {offsets = [6, 0], sizes = [1, 8], strides = [1, 1]} : vector<8x8xf32> to vector<1x8xf32>
    %399 = vector.broadcast %398 : vector<1x8xf32> to vector<8x8xf32>
    %400 = arith.addf %399, %30 : vector<8x8xf32>
    %401 = arith.cmpf ogt, %400, %395 : vector<8x8xf32>
    %402 = arith.select %401, %400, %395 : vector<8x8xi1>, vector<8x8xf32>
    %c6_i32_67 = arith.constant 6 : i32
    %403 = vector.broadcast %c6_i32_67 : i32 to vector<8x8xi32>
    %404 = arith.select %401, %403, %397 : vector<8x8xi1>, vector<8x8xi32>
    %405 = vector.extract_strided_slice %358 {offsets = [7, 0], sizes = [1, 8], strides = [1, 1]} : vector<8x8xf32> to vector<1x8xf32>
    %406 = vector.broadcast %405 : vector<1x8xf32> to vector<8x8xf32>
    %407 = arith.addf %406, %33 : vector<8x8xf32>
    %408 = arith.cmpf ogt, %407, %402 : vector<8x8xf32>
    %409 = arith.select %408, %407, %402 : vector<8x8xi1>, vector<8x8xf32>
    %c7_i32_68 = arith.constant 7 : i32
    %410 = vector.broadcast %c7_i32_68 : i32 to vector<8x8xi32>
    %411 = arith.select %408, %410, %404 : vector<8x8xi1>, vector<8x8xi32>
    %c5 = arith.constant 5 : index
    %c0_69 = arith.constant 0 : index
    %c0_70 = arith.constant 0 : index
    %412 = vector.load %arg9[%c5, %c0_69, %c0_70] : memref<8x8x8xi32, #tpu.memory_space<vmem>>, vector<1x8x8xi32>
    %413 = vector.shape_cast %412 : vector<1x8x8xi32> to vector<8x8xi32>
    %414 = vector.shape_cast %411 : vector<8x8xi32> to vector<1x8x8xi32>
    tpu.vector_store %arg9[%c5, %c0_69, %c0_70], %414 {strides = array<i32>} : memref<8x8x8xi32, #tpu.memory_space<vmem>>, vector<1x8x8xi32>,
    %415 = vector.extract_strided_slice %6 {offsets = [0, 40], sizes = [8, 8], strides = [1, 1]} : vector<8x64xf32> to vector<8x8xf32>
    %416 = arith.addf %409, %415 : vector<8x8xf32>
    %417 = vector.extract_strided_slice %7 {offsets = [5, 0], sizes = [1, 8], strides = [1, 1]} : vector<8x8xf32> to vector<1x8xf32>
    %cst_71 = arith.constant 0.000000e+00 : f32
    %418 = vector.broadcast %cst_71 : f32 to vector<1x8xf32>
    %419 = arith.cmpf ogt, %417, %418 : vector<1x8xf32>
    %420 = vector.shape_cast %419 : vector<1x8xi1> to vector<1x8xi1>
    %421 = vector.broadcast %420 : vector<1x8xi1> to vector<8x8xi1>
    %422 = arith.select %421, %416, %358 : vector<8x8xi1>, vector<8x8xf32>
    %423 = vector.extract_strided_slice %422 {offsets = [0, 0], sizes = [1, 8], strides = [1, 1]} : vector<8x8xf32> to vector<1x8xf32>
    %424 = vector.broadcast %423 : vector<1x8xf32> to vector<8x8xf32>
    %425 = arith.addf %424, %12 : vector<8x8xf32>
    %c0_i32_72 = arith.constant 0 : i32
    %426 = vector.broadcast %c0_i32_72 : i32 to vector<8x8xi32>
    %427 = vector.extract_strided_slice %422 {offsets = [1, 0], sizes = [1, 8], strides = [1, 1]} : vector<8x8xf32> to vector<1x8xf32>
    %428 = vector.broadcast %427 : vector<1x8xf32> to vector<8x8xf32>
    %429 = arith.addf %428, %15 : vector<8x8xf32>
    %430 = arith.cmpf ogt, %429, %425 : vector<8x8xf32>
    %431 = arith.select %430, %429, %425 : vector<8x8xi1>, vector<8x8xf32>
    %c1_i32_73 = arith.constant 1 : i32
    %432 = vector.broadcast %c1_i32_73 : i32 to vector<8x8xi32>
    %433 = arith.select %430, %432, %426 : vector<8x8xi1>, vector<8x8xi32>
    %434 = vector.extract_strided_slice %422 {offsets = [2, 0], sizes = [1, 8], strides = [1, 1]} : vector<8x8xf32> to vector<1x8xf32>
    %435 = vector.broadcast %434 : vector<1x8xf32> to vector<8x8xf32>
    %436 = arith.addf %435, %18 : vector<8x8xf32>
    %437 = arith.cmpf ogt, %436, %431 : vector<8x8xf32>
    %438 = arith.select %437, %436, %431 : vector<8x8xi1>, vector<8x8xf32>
    %c2_i32_74 = arith.constant 2 : i32
    %439 = vector.broadcast %c2_i32_74 : i32 to vector<8x8xi32>
    %440 = arith.select %437, %439, %433 : vector<8x8xi1>, vector<8x8xi32>
    %441 = vector.extract_strided_slice %422 {offsets = [3, 0], sizes = [1, 8], strides = [1, 1]} : vector<8x8xf32> to vector<1x8xf32>
    %442 = vector.broadcast %441 : vector<1x8xf32> to vector<8x8xf32>
    %443 = arith.addf %442, %21 : vector<8x8xf32>
    %444 = arith.cmpf ogt, %443, %438 : vector<8x8xf32>
    %445 = arith.select %444, %443, %438 : vector<8x8xi1>, vector<8x8xf32>
    %c3_i32_75 = arith.constant 3 : i32
    %446 = vector.broadcast %c3_i32_75 : i32 to vector<8x8xi32>
    %447 = arith.select %444, %446, %440 : vector<8x8xi1>, vector<8x8xi32>
    %448 = vector.extract_strided_slice %422 {offsets = [4, 0], sizes = [1, 8], strides = [1, 1]} : vector<8x8xf32> to vector<1x8xf32>
    %449 = vector.broadcast %448 : vector<1x8xf32> to vector<8x8xf32>
    %450 = arith.addf %449, %24 : vector<8x8xf32>
    %451 = arith.cmpf ogt, %450, %445 : vector<8x8xf32>
    %452 = arith.select %451, %450, %445 : vector<8x8xi1>, vector<8x8xf32>
    %c4_i32_76 = arith.constant 4 : i32
    %453 = vector.broadcast %c4_i32_76 : i32 to vector<8x8xi32>
    %454 = arith.select %451, %453, %447 : vector<8x8xi1>, vector<8x8xi32>
    %455 = vector.extract_strided_slice %422 {offsets = [5, 0], sizes = [1, 8], strides = [1, 1]} : vector<8x8xf32> to vector<1x8xf32>
    %456 = vector.broadcast %455 : vector<1x8xf32> to vector<8x8xf32>
    %457 = arith.addf %456, %27 : vector<8x8xf32>
    %458 = arith.cmpf ogt, %457, %452 : vector<8x8xf32>
    %459 = arith.select %458, %457, %452 : vector<8x8xi1>, vector<8x8xf32>
    %c5_i32_77 = arith.constant 5 : i32
    %460 = vector.broadcast %c5_i32_77 : i32 to vector<8x8xi32>
    %461 = arith.select %458, %460, %454 : vector<8x8xi1>, vector<8x8xi32>
    %462 = vector.extract_strided_slice %422 {offsets = [6, 0], sizes = [1, 8], strides = [1, 1]} : vector<8x8xf32> to vector<1x8xf32>
    %463 = vector.broadcast %462 : vector<1x8xf32> to vector<8x8xf32>
    %464 = arith.addf %463, %30 : vector<8x8xf32>
    %465 = arith.cmpf ogt, %464, %459 : vector<8x8xf32>
    %466 = arith.select %465, %464, %459 : vector<8x8xi1>, vector<8x8xf32>
    %c6_i32_78 = arith.constant 6 : i32
    %467 = vector.broadcast %c6_i32_78 : i32 to vector<8x8xi32>
    %468 = arith.select %465, %467, %461 : vector<8x8xi1>, vector<8x8xi32>
    %469 = vector.extract_strided_slice %422 {offsets = [7, 0], sizes = [1, 8], strides = [1, 1]} : vector<8x8xf32> to vector<1x8xf32>
    %470 = vector.broadcast %469 : vector<1x8xf32> to vector<8x8xf32>
    %471 = arith.addf %470, %33 : vector<8x8xf32>
    %472 = arith.cmpf ogt, %471, %466 : vector<8x8xf32>
    %473 = arith.select %472, %471, %466 : vector<8x8xi1>, vector<8x8xf32>
    %c7_i32_79 = arith.constant 7 : i32
    %474 = vector.broadcast %c7_i32_79 : i32 to vector<8x8xi32>
    %475 = arith.select %472, %474, %468 : vector<8x8xi1>, vector<8x8xi32>
    %c6 = arith.constant 6 : index
    %c0_80 = arith.constant 0 : index
    %c0_81 = arith.constant 0 : index
    %476 = vector.load %arg9[%c6, %c0_80, %c0_81] : memref<8x8x8xi32, #tpu.memory_space<vmem>>, vector<1x8x8xi32>
    %477 = vector.shape_cast %476 : vector<1x8x8xi32> to vector<8x8xi32>
    %478 = vector.shape_cast %475 : vector<8x8xi32> to vector<1x8x8xi32>
    tpu.vector_store %arg9[%c6, %c0_80, %c0_81], %478 {strides = array<i32>} : memref<8x8x8xi32, #tpu.memory_space<vmem>>, vector<1x8x8xi32>,
    %479 = vector.extract_strided_slice %6 {offsets = [0, 48], sizes = [8, 8], strides = [1, 1]} : vector<8x64xf32> to vector<8x8xf32>
    %480 = arith.addf %473, %479 : vector<8x8xf32>
    %481 = vector.extract_strided_slice %7 {offsets = [6, 0], sizes = [1, 8], strides = [1, 1]} : vector<8x8xf32> to vector<1x8xf32>
    %cst_82 = arith.constant 0.000000e+00 : f32
    %482 = vector.broadcast %cst_82 : f32 to vector<1x8xf32>
    %483 = arith.cmpf ogt, %481, %482 : vector<1x8xf32>
    %484 = vector.shape_cast %483 : vector<1x8xi1> to vector<1x8xi1>
    %485 = vector.broadcast %484 : vector<1x8xi1> to vector<8x8xi1>
    %486 = arith.select %485, %480, %422 : vector<8x8xi1>, vector<8x8xf32>
    %487 = vector.extract_strided_slice %486 {offsets = [0, 0], sizes = [1, 8], strides = [1, 1]} : vector<8x8xf32> to vector<1x8xf32>
    %488 = vector.broadcast %487 : vector<1x8xf32> to vector<8x8xf32>
    %489 = arith.addf %488, %12 : vector<8x8xf32>
    %c0_i32_83 = arith.constant 0 : i32
    %490 = vector.broadcast %c0_i32_83 : i32 to vector<8x8xi32>
    %491 = vector.extract_strided_slice %486 {offsets = [1, 0], sizes = [1, 8], strides = [1, 1]} : vector<8x8xf32> to vector<1x8xf32>
    %492 = vector.broadcast %491 : vector<1x8xf32> to vector<8x8xf32>
    %493 = arith.addf %492, %15 : vector<8x8xf32>
    %494 = arith.cmpf ogt, %493, %489 : vector<8x8xf32>
    %495 = arith.select %494, %493, %489 : vector<8x8xi1>, vector<8x8xf32>
    %c1_i32_84 = arith.constant 1 : i32
    %496 = vector.broadcast %c1_i32_84 : i32 to vector<8x8xi32>
    %497 = arith.select %494, %496, %490 : vector<8x8xi1>, vector<8x8xi32>
    %498 = vector.extract_strided_slice %486 {offsets = [2, 0], sizes = [1, 8], strides = [1, 1]} : vector<8x8xf32> to vector<1x8xf32>
    %499 = vector.broadcast %498 : vector<1x8xf32> to vector<8x8xf32>
    %500 = arith.addf %499, %18 : vector<8x8xf32>
    %501 = arith.cmpf ogt, %500, %495 : vector<8x8xf32>
    %502 = arith.select %501, %500, %495 : vector<8x8xi1>, vector<8x8xf32>
    %c2_i32_85 = arith.constant 2 : i32
    %503 = vector.broadcast %c2_i32_85 : i32 to vector<8x8xi32>
    %504 = arith.select %501, %503, %497 : vector<8x8xi1>, vector<8x8xi32>
    %505 = vector.extract_strided_slice %486 {offsets = [3, 0], sizes = [1, 8], strides = [1, 1]} : vector<8x8xf32> to vector<1x8xf32>
    %506 = vector.broadcast %505 : vector<1x8xf32> to vector<8x8xf32>
    %507 = arith.addf %506, %21 : vector<8x8xf32>
    %508 = arith.cmpf ogt, %507, %502 : vector<8x8xf32>
    %509 = arith.select %508, %507, %502 : vector<8x8xi1>, vector<8x8xf32>
    %c3_i32_86 = arith.constant 3 : i32
    %510 = vector.broadcast %c3_i32_86 : i32 to vector<8x8xi32>
    %511 = arith.select %508, %510, %504 : vector<8x8xi1>, vector<8x8xi32>
    %512 = vector.extract_strided_slice %486 {offsets = [4, 0], sizes = [1, 8], strides = [1, 1]} : vector<8x8xf32> to vector<1x8xf32>
    %513 = vector.broadcast %512 : vector<1x8xf32> to vector<8x8xf32>
    %514 = arith.addf %513, %24 : vector<8x8xf32>
    %515 = arith.cmpf ogt, %514, %509 : vector<8x8xf32>
    %516 = arith.select %515, %514, %509 : vector<8x8xi1>, vector<8x8xf32>
    %c4_i32_87 = arith.constant 4 : i32
    %517 = vector.broadcast %c4_i32_87 : i32 to vector<8x8xi32>
    %518 = arith.select %515, %517, %511 : vector<8x8xi1>, vector<8x8xi32>
    %519 = vector.extract_strided_slice %486 {offsets = [5, 0], sizes = [1, 8], strides = [1, 1]} : vector<8x8xf32> to vector<1x8xf32>
    %520 = vector.broadcast %519 : vector<1x8xf32> to vector<8x8xf32>
    %521 = arith.addf %520, %27 : vector<8x8xf32>
    %522 = arith.cmpf ogt, %521, %516 : vector<8x8xf32>
    %523 = arith.select %522, %521, %516 : vector<8x8xi1>, vector<8x8xf32>
    %c5_i32_88 = arith.constant 5 : i32
    %524 = vector.broadcast %c5_i32_88 : i32 to vector<8x8xi32>
    %525 = arith.select %522, %524, %518 : vector<8x8xi1>, vector<8x8xi32>
    %526 = vector.extract_strided_slice %486 {offsets = [6, 0], sizes = [1, 8], strides = [1, 1]} : vector<8x8xf32> to vector<1x8xf32>
    %527 = vector.broadcast %526 : vector<1x8xf32> to vector<8x8xf32>
    %528 = arith.addf %527, %30 : vector<8x8xf32>
    %529 = arith.cmpf ogt, %528, %523 : vector<8x8xf32>
    %530 = arith.select %529, %528, %523 : vector<8x8xi1>, vector<8x8xf32>
    %c6_i32_89 = arith.constant 6 : i32
    %531 = vector.broadcast %c6_i32_89 : i32 to vector<8x8xi32>
    %532 = arith.select %529, %531, %525 : vector<8x8xi1>, vector<8x8xi32>
    %533 = vector.extract_strided_slice %486 {offsets = [7, 0], sizes = [1, 8], strides = [1, 1]} : vector<8x8xf32> to vector<1x8xf32>
    %534 = vector.broadcast %533 : vector<1x8xf32> to vector<8x8xf32>
    %535 = arith.addf %534, %33 : vector<8x8xf32>
    %536 = arith.cmpf ogt, %535, %530 : vector<8x8xf32>
    %537 = arith.select %536, %535, %530 : vector<8x8xi1>, vector<8x8xf32>
    %c7_i32_90 = arith.constant 7 : i32
    %538 = vector.broadcast %c7_i32_90 : i32 to vector<8x8xi32>
    %539 = arith.select %536, %538, %532 : vector<8x8xi1>, vector<8x8xi32>
    %c7 = arith.constant 7 : index
    %c0_91 = arith.constant 0 : index
    %c0_92 = arith.constant 0 : index
    %540 = vector.load %arg9[%c7, %c0_91, %c0_92] : memref<8x8x8xi32, #tpu.memory_space<vmem>>, vector<1x8x8xi32>
    %541 = vector.shape_cast %540 : vector<1x8x8xi32> to vector<8x8xi32>
    %542 = vector.shape_cast %539 : vector<8x8xi32> to vector<1x8x8xi32>
    tpu.vector_store %arg9[%c7, %c0_91, %c0_92], %542 {strides = array<i32>} : memref<8x8x8xi32, #tpu.memory_space<vmem>>, vector<1x8x8xi32>,
    %543 = vector.extract_strided_slice %6 {offsets = [0, 56], sizes = [8, 8], strides = [1, 1]} : vector<8x64xf32> to vector<8x8xf32>
    %544 = arith.addf %537, %543 : vector<8x8xf32>
    %545 = vector.extract_strided_slice %7 {offsets = [7, 0], sizes = [1, 8], strides = [1, 1]} : vector<8x8xf32> to vector<1x8xf32>
    %cst_93 = arith.constant 0.000000e+00 : f32
    %546 = vector.broadcast %cst_93 : f32 to vector<1x8xf32>
    %547 = arith.cmpf ogt, %545, %546 : vector<1x8xf32>
    %548 = vector.shape_cast %547 : vector<1x8xi1> to vector<1x8xi1>
    %549 = vector.broadcast %548 : vector<1x8xi1> to vector<8x8xi1>
    %550 = arith.select %549, %544, %486 : vector<8x8xi1>, vector<8x8xf32>
    %c0_94 = arith.constant 0 : index
    %c0_95 = arith.constant 0 : index
    %551 = vector.load %arg6[%c0_94, %c0_95] : memref<8x1xf32, #tpu.memory_space<vmem>>, vector<8x1xf32>
    %552 = vector.broadcast %551 : vector<8x1xf32> to vector<8x8xf32>
    %553 = arith.addf %550, %552 : vector<8x8xf32>
    %554 = vector.extract_strided_slice %553 {offsets = [0, 0], sizes = [1, 8], strides = [1, 1]} : vector<8x8xf32> to vector<1x8xf32>
    %c0_i32_96 = arith.constant 0 : i32
    %555 = vector.broadcast %c0_i32_96 : i32 to vector<1x8xi32>
    %556 = vector.extract_strided_slice %553 {offsets = [1, 0], sizes = [1, 8], strides = [1, 1]} : vector<8x8xf32> to vector<1x8xf32>
    %557 = arith.cmpf ogt, %556, %554 : vector<1x8xf32>
    %558 = arith.select %557, %556, %554 : vector<1x8xi1>, vector<1x8xf32>
    %c1_i32_97 = arith.constant 1 : i32
    %559 = vector.broadcast %c1_i32_97 : i32 to vector<1x8xi32>
    %560 = arith.select %557, %559, %555 : vector<1x8xi1>, vector<1x8xi32>
    %561 = vector.extract_strided_slice %553 {offsets = [2, 0], sizes = [1, 8], strides = [1, 1]} : vector<8x8xf32> to vector<1x8xf32>
    %562 = arith.cmpf ogt, %561, %558 : vector<1x8xf32>
    %563 = arith.select %562, %561, %558 : vector<1x8xi1>, vector<1x8xf32>
    %c2_i32_98 = arith.constant 2 : i32
    %564 = vector.broadcast %c2_i32_98 : i32 to vector<1x8xi32>
    %565 = arith.select %562, %564, %560 : vector<1x8xi1>, vector<1x8xi32>
    %566 = vector.extract_strided_slice %553 {offsets = [3, 0], sizes = [1, 8], strides = [1, 1]} : vector<8x8xf32> to vector<1x8xf32>
    %567 = arith.cmpf ogt, %566, %563 : vector<1x8xf32>
    %568 = arith.select %567, %566, %563 : vector<1x8xi1>, vector<1x8xf32>
    %c3_i32_99 = arith.constant 3 : i32
    %569 = vector.broadcast %c3_i32_99 : i32 to vector<1x8xi32>
    %570 = arith.select %567, %569, %565 : vector<1x8xi1>, vector<1x8xi32>
    %571 = vector.extract_strided_slice %553 {offsets = [4, 0], sizes = [1, 8], strides = [1, 1]} : vector<8x8xf32> to vector<1x8xf32>
    %572 = arith.cmpf ogt, %571, %568 : vector<1x8xf32>
    %573 = arith.select %572, %571, %568 : vector<1x8xi1>, vector<1x8xf32>
    %c4_i32_100 = arith.constant 4 : i32
    %574 = vector.broadcast %c4_i32_100 : i32 to vector<1x8xi32>
    %575 = arith.select %572, %574, %570 : vector<1x8xi1>, vector<1x8xi32>
    %576 = vector.extract_strided_slice %553 {offsets = [5, 0], sizes = [1, 8], strides = [1, 1]} : vector<8x8xf32> to vector<1x8xf32>
    %577 = arith.cmpf ogt, %576, %573 : vector<1x8xf32>
    %578 = arith.select %577, %576, %573 : vector<1x8xi1>, vector<1x8xf32>
    %c5_i32_101 = arith.constant 5 : i32
    %579 = vector.broadcast %c5_i32_101 : i32 to vector<1x8xi32>
    %580 = arith.select %577, %579, %575 : vector<1x8xi1>, vector<1x8xi32>
    %581 = vector.extract_strided_slice %553 {offsets = [6, 0], sizes = [1, 8], strides = [1, 1]} : vector<8x8xf32> to vector<1x8xf32>
    %582 = arith.cmpf ogt, %581, %578 : vector<1x8xf32>
    %583 = arith.select %582, %581, %578 : vector<1x8xi1>, vector<1x8xf32>
    %c6_i32_102 = arith.constant 6 : i32
    %584 = vector.broadcast %c6_i32_102 : i32 to vector<1x8xi32>
    %585 = arith.select %582, %584, %580 : vector<1x8xi1>, vector<1x8xi32>
    %586 = vector.extract_strided_slice %553 {offsets = [7, 0], sizes = [1, 8], strides = [1, 1]} : vector<8x8xf32> to vector<1x8xf32>
    %587 = arith.cmpf ogt, %586, %583 : vector<1x8xf32>
    %588 = arith.select %587, %586, %583 : vector<1x8xi1>, vector<1x8xf32>
    %c7_i32_103 = arith.constant 7 : i32
    %589 = vector.broadcast %c7_i32_103 : i32 to vector<1x8xi32>
    %590 = arith.select %587, %589, %585 : vector<1x8xi1>, vector<1x8xi32>
    %c0_104 = arith.constant 0 : index
    %c0_105 = arith.constant 0 : index
    %591 = vector.load %arg8[%c0_104, %c0_105] : memref<1x8xf32, #tpu.memory_space<vmem>>, vector<1x8xf32>
    tpu.vector_store %arg8[%c0_104, %c0_105], %588 {strides = array<i32>} : memref<1x8xf32, #tpu.memory_space<vmem>>, vector<1x8xf32>,
    %592 = vector.extract_strided_slice %7 {offsets = [7, 0], sizes = [1, 8], strides = [1, 1]} : vector<8x8xf32> to vector<1x8xf32>
    %cst_106 = arith.constant 0.000000e+00 : f32
    %593 = vector.broadcast %cst_106 : f32 to vector<1x8xf32>
    %594 = arith.cmpf ogt, %592, %593 : vector<1x8xf32>
    %c0_i32_107 = arith.constant 0 : i32
    %595 = vector.broadcast %c0_i32_107 : i32 to vector<1x8xi32>
    %596 = arith.select %594, %590, %595 : vector<1x8xi1>, vector<1x8xi32>
    %c7_108 = arith.constant 7 : index
    %c0_109 = arith.constant 0 : index
    %597 = vector.load %arg7[%c7_108, %c0_109] : memref<8x8xi32, #tpu.memory_space<vmem>>, vector<1x8xi32>
    tpu.vector_store %arg7[%c7_108, %c0_109], %596 {strides = array<i32>} : memref<8x8xi32, #tpu.memory_space<vmem>>, vector<1x8xi32>,
    %598 = vector.extract_strided_slice %7 {offsets = [6, 0], sizes = [1, 8], strides = [1, 1]} : vector<8x8xf32> to vector<1x8xf32>
    %cst_110 = arith.constant 0.000000e+00 : f32
    %599 = vector.broadcast %cst_110 : f32 to vector<1x8xf32>
    %600 = arith.cmpf ogt, %598, %599 : vector<1x8xf32>
    %601 = vector.extract_strided_slice %7 {offsets = [7, 0], sizes = [1, 8], strides = [1, 1]} : vector<8x8xf32> to vector<1x8xf32>
    %cst_111 = arith.constant 0.000000e+00 : f32
    %602 = vector.broadcast %cst_111 : f32 to vector<1x8xf32>
    %603 = arith.cmpf ogt, %601, %602 : vector<1x8xf32>
    %604 = arith.andi %600, %603 : vector<1x8xi1>
    %c7_112 = arith.constant 7 : index
    %c0_113 = arith.constant 0 : index
    %c0_114 = arith.constant 0 : index
    %605 = vector.load %arg9[%c7_112, %c0_113, %c0_114] : memref<8x8x8xi32, #tpu.memory_space<vmem>>, vector<1x8x8xi32>
    %606 = vector.shape_cast %605 : vector<1x8x8xi32> to vector<8x8xi32>
    %607 = vector.extract_strided_slice %606 {offsets = [0, 0], sizes = [1, 8], strides = [1, 1]} : vector<8x8xi32> to vector<1x8xi32>
    %c1_i32_115 = arith.constant 1 : i32
    %608 = vector.broadcast %c1_i32_115 : i32 to vector<1x8xi32>
    %609 = arith.cmpi eq, %590, %608 : vector<1x8xi32>
    %610 = vector.extract_strided_slice %606 {offsets = [1, 0], sizes = [1, 8], strides = [1, 1]} : vector<8x8xi32> to vector<1x8xi32>
    %611 = arith.select %609, %610, %607 : vector<1x8xi1>, vector<1x8xi32>
    %c2_i32_116 = arith.constant 2 : i32
    %612 = vector.broadcast %c2_i32_116 : i32 to vector<1x8xi32>
    %613 = arith.cmpi eq, %590, %612 : vector<1x8xi32>
    %614 = vector.extract_strided_slice %606 {offsets = [2, 0], sizes = [1, 8], strides = [1, 1]} : vector<8x8xi32> to vector<1x8xi32>
    %615 = arith.select %613, %614, %611 : vector<1x8xi1>, vector<1x8xi32>
    %c3_i32_117 = arith.constant 3 : i32
    %616 = vector.broadcast %c3_i32_117 : i32 to vector<1x8xi32>
    %617 = arith.cmpi eq, %590, %616 : vector<1x8xi32>
    %618 = vector.extract_strided_slice %606 {offsets = [3, 0], sizes = [1, 8], strides = [1, 1]} : vector<8x8xi32> to vector<1x8xi32>
    %619 = arith.select %617, %618, %615 : vector<1x8xi1>, vector<1x8xi32>
    %c4_i32_118 = arith.constant 4 : i32
    %620 = vector.broadcast %c4_i32_118 : i32 to vector<1x8xi32>
    %621 = arith.cmpi eq, %590, %620 : vector<1x8xi32>
    %622 = vector.extract_strided_slice %606 {offsets = [4, 0], sizes = [1, 8], strides = [1, 1]} : vector<8x8xi32> to vector<1x8xi32>
    %623 = arith.select %621, %622, %619 : vector<1x8xi1>, vector<1x8xi32>
    %c5_i32_119 = arith.constant 5 : i32
    %624 = vector.broadcast %c5_i32_119 : i32 to vector<1x8xi32>
    %625 = arith.cmpi eq, %590, %624 : vector<1x8xi32>
    %626 = vector.extract_strided_slice %606 {offsets = [5, 0], sizes = [1, 8], strides = [1, 1]} : vector<8x8xi32> to vector<1x8xi32>
    %627 = arith.select %625, %626, %623 : vector<1x8xi1>, vector<1x8xi32>
    %c6_i32_120 = arith.constant 6 : i32
    %628 = vector.broadcast %c6_i32_120 : i32 to vector<1x8xi32>
    %629 = arith.cmpi eq, %590, %628 : vector<1x8xi32>
    %630 = vector.extract_strided_slice %606 {offsets = [6, 0], sizes = [1, 8], strides = [1, 1]} : vector<8x8xi32> to vector<1x8xi32>
    %631 = arith.select %629, %630, %627 : vector<1x8xi1>, vector<1x8xi32>
    %c7_i32_121 = arith.constant 7 : i32
    %632 = vector.broadcast %c7_i32_121 : i32 to vector<1x8xi32>
    %633 = arith.cmpi eq, %590, %632 : vector<1x8xi32>
    %634 = vector.extract_strided_slice %606 {offsets = [7, 0], sizes = [1, 8], strides = [1, 1]} : vector<8x8xi32> to vector<1x8xi32>
    %635 = arith.select %633, %634, %631 : vector<1x8xi1>, vector<1x8xi32>
    %636 = arith.select %604, %635, %590 : vector<1x8xi1>, vector<1x8xi32>
    %637 = vector.extract_strided_slice %7 {offsets = [6, 0], sizes = [1, 8], strides = [1, 1]} : vector<8x8xf32> to vector<1x8xf32>
    %cst_122 = arith.constant 0.000000e+00 : f32
    %638 = vector.broadcast %cst_122 : f32 to vector<1x8xf32>
    %639 = arith.cmpf ogt, %637, %638 : vector<1x8xf32>
    %c0_i32_123 = arith.constant 0 : i32
    %640 = vector.broadcast %c0_i32_123 : i32 to vector<1x8xi32>
    %641 = arith.select %639, %636, %640 : vector<1x8xi1>, vector<1x8xi32>
    %c6_124 = arith.constant 6 : index
    %c0_125 = arith.constant 0 : index
    %642 = vector.load %arg7[%c6_124, %c0_125] : memref<8x8xi32, #tpu.memory_space<vmem>>, vector<1x8xi32>
    tpu.vector_store %arg7[%c6_124, %c0_125], %641 {strides = array<i32>} : memref<8x8xi32, #tpu.memory_space<vmem>>, vector<1x8xi32>,
    %643 = vector.extract_strided_slice %7 {offsets = [5, 0], sizes = [1, 8], strides = [1, 1]} : vector<8x8xf32> to vector<1x8xf32>
    %cst_126 = arith.constant 0.000000e+00 : f32
    %644 = vector.broadcast %cst_126 : f32 to vector<1x8xf32>
    %645 = arith.cmpf ogt, %643, %644 : vector<1x8xf32>
    %646 = vector.extract_strided_slice %7 {offsets = [6, 0], sizes = [1, 8], strides = [1, 1]} : vector<8x8xf32> to vector<1x8xf32>
    %cst_127 = arith.constant 0.000000e+00 : f32
    %647 = vector.broadcast %cst_127 : f32 to vector<1x8xf32>
    %648 = arith.cmpf ogt, %646, %647 : vector<1x8xf32>
    %649 = arith.andi %645, %648 : vector<1x8xi1>
    %c6_128 = arith.constant 6 : index
    %c0_129 = arith.constant 0 : index
    %c0_130 = arith.constant 0 : index
    %650 = vector.load %arg9[%c6_128, %c0_129, %c0_130] : memref<8x8x8xi32, #tpu.memory_space<vmem>>, vector<1x8x8xi32>
    %651 = vector.shape_cast %650 : vector<1x8x8xi32> to vector<8x8xi32>
    %652 = vector.extract_strided_slice %651 {offsets = [0, 0], sizes = [1, 8], strides = [1, 1]} : vector<8x8xi32> to vector<1x8xi32>
    %c1_i32_131 = arith.constant 1 : i32
    %653 = vector.broadcast %c1_i32_131 : i32 to vector<1x8xi32>
    %654 = arith.cmpi eq, %636, %653 : vector<1x8xi32>
    %655 = vector.extract_strided_slice %651 {offsets = [1, 0], sizes = [1, 8], strides = [1, 1]} : vector<8x8xi32> to vector<1x8xi32>
    %656 = arith.select %654, %655, %652 : vector<1x8xi1>, vector<1x8xi32>
    %c2_i32_132 = arith.constant 2 : i32
    %657 = vector.broadcast %c2_i32_132 : i32 to vector<1x8xi32>
    %658 = arith.cmpi eq, %636, %657 : vector<1x8xi32>
    %659 = vector.extract_strided_slice %651 {offsets = [2, 0], sizes = [1, 8], strides = [1, 1]} : vector<8x8xi32> to vector<1x8xi32>
    %660 = arith.select %658, %659, %656 : vector<1x8xi1>, vector<1x8xi32>
    %c3_i32_133 = arith.constant 3 : i32
    %661 = vector.broadcast %c3_i32_133 : i32 to vector<1x8xi32>
    %662 = arith.cmpi eq, %636, %661 : vector<1x8xi32>
    %663 = vector.extract_strided_slice %651 {offsets = [3, 0], sizes = [1, 8], strides = [1, 1]} : vector<8x8xi32> to vector<1x8xi32>
    %664 = arith.select %662, %663, %660 : vector<1x8xi1>, vector<1x8xi32>
    %c4_i32_134 = arith.constant 4 : i32
    %665 = vector.broadcast %c4_i32_134 : i32 to vector<1x8xi32>
    %666 = arith.cmpi eq, %636, %665 : vector<1x8xi32>
    %667 = vector.extract_strided_slice %651 {offsets = [4, 0], sizes = [1, 8], strides = [1, 1]} : vector<8x8xi32> to vector<1x8xi32>
    %668 = arith.select %666, %667, %664 : vector<1x8xi1>, vector<1x8xi32>
    %c5_i32_135 = arith.constant 5 : i32
    %669 = vector.broadcast %c5_i32_135 : i32 to vector<1x8xi32>
    %670 = arith.cmpi eq, %636, %669 : vector<1x8xi32>
    %671 = vector.extract_strided_slice %651 {offsets = [5, 0], sizes = [1, 8], strides = [1, 1]} : vector<8x8xi32> to vector<1x8xi32>
    %672 = arith.select %670, %671, %668 : vector<1x8xi1>, vector<1x8xi32>
    %c6_i32_136 = arith.constant 6 : i32
    %673 = vector.broadcast %c6_i32_136 : i32 to vector<1x8xi32>
    %674 = arith.cmpi eq, %636, %673 : vector<1x8xi32>
    %675 = vector.extract_strided_slice %651 {offsets = [6, 0], sizes = [1, 8], strides = [1, 1]} : vector<8x8xi32> to vector<1x8xi32>
    %676 = arith.select %674, %675, %672 : vector<1x8xi1>, vector<1x8xi32>
    %c7_i32_137 = arith.constant 7 : i32
    %677 = vector.broadcast %c7_i32_137 : i32 to vector<1x8xi32>
    %678 = arith.cmpi eq, %636, %677 : vector<1x8xi32>
    %679 = vector.extract_strided_slice %651 {offsets = [7, 0], sizes = [1, 8], strides = [1, 1]} : vector<8x8xi32> to vector<1x8xi32>
    %680 = arith.select %678, %679, %676 : vector<1x8xi1>, vector<1x8xi32>
    %681 = arith.select %649, %680, %636 : vector<1x8xi1>, vector<1x8xi32>
    %682 = vector.extract_strided_slice %7 {offsets = [5, 0], sizes = [1, 8], strides = [1, 1]} : vector<8x8xf32> to vector<1x8xf32>
    %cst_138 = arith.constant 0.000000e+00 : f32
    %683 = vector.broadcast %cst_138 : f32 to vector<1x8xf32>
    %684 = arith.cmpf ogt, %682, %683 : vector<1x8xf32>
    %c0_i32_139 = arith.constant 0 : i32
    %685 = vector.broadcast %c0_i32_139 : i32 to vector<1x8xi32>
    %686 = arith.select %684, %681, %685 : vector<1x8xi1>, vector<1x8xi32>
    %c5_140 = arith.constant 5 : index
    %c0_141 = arith.constant 0 : index
    %687 = vector.load %arg7[%c5_140, %c0_141] : memref<8x8xi32, #tpu.memory_space<vmem>>, vector<1x8xi32>
    tpu.vector_store %arg7[%c5_140, %c0_141], %686 {strides = array<i32>} : memref<8x8xi32, #tpu.memory_space<vmem>>, vector<1x8xi32>,
    %688 = vector.extract_strided_slice %7 {offsets = [4, 0], sizes = [1, 8], strides = [1, 1]} : vector<8x8xf32> to vector<1x8xf32>
    %cst_142 = arith.constant 0.000000e+00 : f32
    %689 = vector.broadcast %cst_142 : f32 to vector<1x8xf32>
    %690 = arith.cmpf ogt, %688, %689 : vector<1x8xf32>
    %691 = vector.extract_strided_slice %7 {offsets = [5, 0], sizes = [1, 8], strides = [1, 1]} : vector<8x8xf32> to vector<1x8xf32>
    %cst_143 = arith.constant 0.000000e+00 : f32
    %692 = vector.broadcast %cst_143 : f32 to vector<1x8xf32>
    %693 = arith.cmpf ogt, %691, %692 : vector<1x8xf32>
    %694 = arith.andi %690, %693 : vector<1x8xi1>
    %c5_144 = arith.constant 5 : index
    %c0_145 = arith.constant 0 : index
    %c0_146 = arith.constant 0 : index
    %695 = vector.load %arg9[%c5_144, %c0_145, %c0_146] : memref<8x8x8xi32, #tpu.memory_space<vmem>>, vector<1x8x8xi32>
    %696 = vector.shape_cast %695 : vector<1x8x8xi32> to vector<8x8xi32>
    %697 = vector.extract_strided_slice %696 {offsets = [0, 0], sizes = [1, 8], strides = [1, 1]} : vector<8x8xi32> to vector<1x8xi32>
    %c1_i32_147 = arith.constant 1 : i32
    %698 = vector.broadcast %c1_i32_147 : i32 to vector<1x8xi32>
    %699 = arith.cmpi eq, %681, %698 : vector<1x8xi32>
    %700 = vector.extract_strided_slice %696 {offsets = [1, 0], sizes = [1, 8], strides = [1, 1]} : vector<8x8xi32> to vector<1x8xi32>
    %701 = arith.select %699, %700, %697 : vector<1x8xi1>, vector<1x8xi32>
    %c2_i32_148 = arith.constant 2 : i32
    %702 = vector.broadcast %c2_i32_148 : i32 to vector<1x8xi32>
    %703 = arith.cmpi eq, %681, %702 : vector<1x8xi32>
    %704 = vector.extract_strided_slice %696 {offsets = [2, 0], sizes = [1, 8], strides = [1, 1]} : vector<8x8xi32> to vector<1x8xi32>
    %705 = arith.select %703, %704, %701 : vector<1x8xi1>, vector<1x8xi32>
    %c3_i32_149 = arith.constant 3 : i32
    %706 = vector.broadcast %c3_i32_149 : i32 to vector<1x8xi32>
    %707 = arith.cmpi eq, %681, %706 : vector<1x8xi32>
    %708 = vector.extract_strided_slice %696 {offsets = [3, 0], sizes = [1, 8], strides = [1, 1]} : vector<8x8xi32> to vector<1x8xi32>
    %709 = arith.select %707, %708, %705 : vector<1x8xi1>, vector<1x8xi32>
    %c4_i32_150 = arith.constant 4 : i32
    %710 = vector.broadcast %c4_i32_150 : i32 to vector<1x8xi32>
    %711 = arith.cmpi eq, %681, %710 : vector<1x8xi32>
    %712 = vector.extract_strided_slice %696 {offsets = [4, 0], sizes = [1, 8], strides = [1, 1]} : vector<8x8xi32> to vector<1x8xi32>
    %713 = arith.select %711, %712, %709 : vector<1x8xi1>, vector<1x8xi32>
    %c5_i32_151 = arith.constant 5 : i32
    %714 = vector.broadcast %c5_i32_151 : i32 to vector<1x8xi32>
    %715 = arith.cmpi eq, %681, %714 : vector<1x8xi32>
    %716 = vector.extract_strided_slice %696 {offsets = [5, 0], sizes = [1, 8], strides = [1, 1]} : vector<8x8xi32> to vector<1x8xi32>
    %717 = arith.select %715, %716, %713 : vector<1x8xi1>, vector<1x8xi32>
    %c6_i32_152 = arith.constant 6 : i32
    %718 = vector.broadcast %c6_i32_152 : i32 to vector<1x8xi32>
    %719 = arith.cmpi eq, %681, %718 : vector<1x8xi32>
    %720 = vector.extract_strided_slice %696 {offsets = [6, 0], sizes = [1, 8], strides = [1, 1]} : vector<8x8xi32> to vector<1x8xi32>
    %721 = arith.select %719, %720, %717 : vector<1x8xi1>, vector<1x8xi32>
    %c7_i32_153 = arith.constant 7 : i32
    %722 = vector.broadcast %c7_i32_153 : i32 to vector<1x8xi32>
    %723 = arith.cmpi eq, %681, %722 : vector<1x8xi32>
    %724 = vector.extract_strided_slice %696 {offsets = [7, 0], sizes = [1, 8], strides = [1, 1]} : vector<8x8xi32> to vector<1x8xi32>
    %725 = arith.select %723, %724, %721 : vector<1x8xi1>, vector<1x8xi32>
    %726 = arith.select %694, %725, %681 : vector<1x8xi1>, vector<1x8xi32>
    %727 = vector.extract_strided_slice %7 {offsets = [4, 0], sizes = [1, 8], strides = [1, 1]} : vector<8x8xf32> to vector<1x8xf32>
    %cst_154 = arith.constant 0.000000e+00 : f32
    %728 = vector.broadcast %cst_154 : f32 to vector<1x8xf32>
    %729 = arith.cmpf ogt, %727, %728 : vector<1x8xf32>
    %c0_i32_155 = arith.constant 0 : i32
    %730 = vector.broadcast %c0_i32_155 : i32 to vector<1x8xi32>
    %731 = arith.select %729, %726, %730 : vector<1x8xi1>, vector<1x8xi32>
    %c4_156 = arith.constant 4 : index
    %c0_157 = arith.constant 0 : index
    %732 = vector.load %arg7[%c4_156, %c0_157] : memref<8x8xi32, #tpu.memory_space<vmem>>, vector<1x8xi32>
    tpu.vector_store %arg7[%c4_156, %c0_157], %731 {strides = array<i32>} : memref<8x8xi32, #tpu.memory_space<vmem>>, vector<1x8xi32>,
    %733 = vector.extract_strided_slice %7 {offsets = [3, 0], sizes = [1, 8], strides = [1, 1]} : vector<8x8xf32> to vector<1x8xf32>
    %cst_158 = arith.constant 0.000000e+00 : f32
    %734 = vector.broadcast %cst_158 : f32 to vector<1x8xf32>
    %735 = arith.cmpf ogt, %733, %734 : vector<1x8xf32>
    %736 = vector.extract_strided_slice %7 {offsets = [4, 0], sizes = [1, 8], strides = [1, 1]} : vector<8x8xf32> to vector<1x8xf32>
    %cst_159 = arith.constant 0.000000e+00 : f32
    %737 = vector.broadcast %cst_159 : f32 to vector<1x8xf32>
    %738 = arith.cmpf ogt, %736, %737 : vector<1x8xf32>
    %739 = arith.andi %735, %738 : vector<1x8xi1>
    %c4_160 = arith.constant 4 : index
    %c0_161 = arith.constant 0 : index
    %c0_162 = arith.constant 0 : index
    %740 = vector.load %arg9[%c4_160, %c0_161, %c0_162] : memref<8x8x8xi32, #tpu.memory_space<vmem>>, vector<1x8x8xi32>
    %741 = vector.shape_cast %740 : vector<1x8x8xi32> to vector<8x8xi32>
    %742 = vector.extract_strided_slice %741 {offsets = [0, 0], sizes = [1, 8], strides = [1, 1]} : vector<8x8xi32> to vector<1x8xi32>
    %c1_i32_163 = arith.constant 1 : i32
    %743 = vector.broadcast %c1_i32_163 : i32 to vector<1x8xi32>
    %744 = arith.cmpi eq, %726, %743 : vector<1x8xi32>
    %745 = vector.extract_strided_slice %741 {offsets = [1, 0], sizes = [1, 8], strides = [1, 1]} : vector<8x8xi32> to vector<1x8xi32>
    %746 = arith.select %744, %745, %742 : vector<1x8xi1>, vector<1x8xi32>
    %c2_i32_164 = arith.constant 2 : i32
    %747 = vector.broadcast %c2_i32_164 : i32 to vector<1x8xi32>
    %748 = arith.cmpi eq, %726, %747 : vector<1x8xi32>
    %749 = vector.extract_strided_slice %741 {offsets = [2, 0], sizes = [1, 8], strides = [1, 1]} : vector<8x8xi32> to vector<1x8xi32>
    %750 = arith.select %748, %749, %746 : vector<1x8xi1>, vector<1x8xi32>
    %c3_i32_165 = arith.constant 3 : i32
    %751 = vector.broadcast %c3_i32_165 : i32 to vector<1x8xi32>
    %752 = arith.cmpi eq, %726, %751 : vector<1x8xi32>
    %753 = vector.extract_strided_slice %741 {offsets = [3, 0], sizes = [1, 8], strides = [1, 1]} : vector<8x8xi32> to vector<1x8xi32>
    %754 = arith.select %752, %753, %750 : vector<1x8xi1>, vector<1x8xi32>
    %c4_i32_166 = arith.constant 4 : i32
    %755 = vector.broadcast %c4_i32_166 : i32 to vector<1x8xi32>
    %756 = arith.cmpi eq, %726, %755 : vector<1x8xi32>
    %757 = vector.extract_strided_slice %741 {offsets = [4, 0], sizes = [1, 8], strides = [1, 1]} : vector<8x8xi32> to vector<1x8xi32>
    %758 = arith.select %756, %757, %754 : vector<1x8xi1>, vector<1x8xi32>
    %c5_i32_167 = arith.constant 5 : i32
    %759 = vector.broadcast %c5_i32_167 : i32 to vector<1x8xi32>
    %760 = arith.cmpi eq, %726, %759 : vector<1x8xi32>
    %761 = vector.extract_strided_slice %741 {offsets = [5, 0], sizes = [1, 8], strides = [1, 1]} : vector<8x8xi32> to vector<1x8xi32>
    %762 = arith.select %760, %761, %758 : vector<1x8xi1>, vector<1x8xi32>
    %c6_i32_168 = arith.constant 6 : i32
    %763 = vector.broadcast %c6_i32_168 : i32 to vector<1x8xi32>
    %764 = arith.cmpi eq, %726, %763 : vector<1x8xi32>
    %765 = vector.extract_strided_slice %741 {offsets = [6, 0], sizes = [1, 8], strides = [1, 1]} : vector<8x8xi32> to vector<1x8xi32>
    %766 = arith.select %764, %765, %762 : vector<1x8xi1>, vector<1x8xi32>
    %c7_i32_169 = arith.constant 7 : i32
    %767 = vector.broadcast %c7_i32_169 : i32 to vector<1x8xi32>
    %768 = arith.cmpi eq, %726, %767 : vector<1x8xi32>
    %769 = vector.extract_strided_slice %741 {offsets = [7, 0], sizes = [1, 8], strides = [1, 1]} : vector<8x8xi32> to vector<1x8xi32>
    %770 = arith.select %768, %769, %766 : vector<1x8xi1>, vector<1x8xi32>
    %771 = arith.select %739, %770, %726 : vector<1x8xi1>, vector<1x8xi32>
    %772 = vector.extract_strided_slice %7 {offsets = [3, 0], sizes = [1, 8], strides = [1, 1]} : vector<8x8xf32> to vector<1x8xf32>
    %cst_170 = arith.constant 0.000000e+00 : f32
    %773 = vector.broadcast %cst_170 : f32 to vector<1x8xf32>
    %774 = arith.cmpf ogt, %772, %773 : vector<1x8xf32>
    %c0_i32_171 = arith.constant 0 : i32
    %775 = vector.broadcast %c0_i32_171 : i32 to vector<1x8xi32>
    %776 = arith.select %774, %771, %775 : vector<1x8xi1>, vector<1x8xi32>
    %c3_172 = arith.constant 3 : index
    %c0_173 = arith.constant 0 : index
    %777 = vector.load %arg7[%c3_172, %c0_173] : memref<8x8xi32, #tpu.memory_space<vmem>>, vector<1x8xi32>
    tpu.vector_store %arg7[%c3_172, %c0_173], %776 {strides = array<i32>} : memref<8x8xi32, #tpu.memory_space<vmem>>, vector<1x8xi32>,
    %778 = vector.extract_strided_slice %7 {offsets = [2, 0], sizes = [1, 8], strides = [1, 1]} : vector<8x8xf32> to vector<1x8xf32>
    %cst_174 = arith.constant 0.000000e+00 : f32
    %779 = vector.broadcast %cst_174 : f32 to vector<1x8xf32>
    %780 = arith.cmpf ogt, %778, %779 : vector<1x8xf32>
    %781 = vector.extract_strided_slice %7 {offsets = [3, 0], sizes = [1, 8], strides = [1, 1]} : vector<8x8xf32> to vector<1x8xf32>
    %cst_175 = arith.constant 0.000000e+00 : f32
    %782 = vector.broadcast %cst_175 : f32 to vector<1x8xf32>
    %783 = arith.cmpf ogt, %781, %782 : vector<1x8xf32>
    %784 = arith.andi %780, %783 : vector<1x8xi1>
    %c3_176 = arith.constant 3 : index
    %c0_177 = arith.constant 0 : index
    %c0_178 = arith.constant 0 : index
    %785 = vector.load %arg9[%c3_176, %c0_177, %c0_178] : memref<8x8x8xi32, #tpu.memory_space<vmem>>, vector<1x8x8xi32>
    %786 = vector.shape_cast %785 : vector<1x8x8xi32> to vector<8x8xi32>
    %787 = vector.extract_strided_slice %786 {offsets = [0, 0], sizes = [1, 8], strides = [1, 1]} : vector<8x8xi32> to vector<1x8xi32>
    %c1_i32_179 = arith.constant 1 : i32
    %788 = vector.broadcast %c1_i32_179 : i32 to vector<1x8xi32>
    %789 = arith.cmpi eq, %771, %788 : vector<1x8xi32>
    %790 = vector.extract_strided_slice %786 {offsets = [1, 0], sizes = [1, 8], strides = [1, 1]} : vector<8x8xi32> to vector<1x8xi32>
    %791 = arith.select %789, %790, %787 : vector<1x8xi1>, vector<1x8xi32>
    %c2_i32_180 = arith.constant 2 : i32
    %792 = vector.broadcast %c2_i32_180 : i32 to vector<1x8xi32>
    %793 = arith.cmpi eq, %771, %792 : vector<1x8xi32>
    %794 = vector.extract_strided_slice %786 {offsets = [2, 0], sizes = [1, 8], strides = [1, 1]} : vector<8x8xi32> to vector<1x8xi32>
    %795 = arith.select %793, %794, %791 : vector<1x8xi1>, vector<1x8xi32>
    %c3_i32_181 = arith.constant 3 : i32
    %796 = vector.broadcast %c3_i32_181 : i32 to vector<1x8xi32>
    %797 = arith.cmpi eq, %771, %796 : vector<1x8xi32>
    %798 = vector.extract_strided_slice %786 {offsets = [3, 0], sizes = [1, 8], strides = [1, 1]} : vector<8x8xi32> to vector<1x8xi32>
    %799 = arith.select %797, %798, %795 : vector<1x8xi1>, vector<1x8xi32>
    %c4_i32_182 = arith.constant 4 : i32
    %800 = vector.broadcast %c4_i32_182 : i32 to vector<1x8xi32>
    %801 = arith.cmpi eq, %771, %800 : vector<1x8xi32>
    %802 = vector.extract_strided_slice %786 {offsets = [4, 0], sizes = [1, 8], strides = [1, 1]} : vector<8x8xi32> to vector<1x8xi32>
    %803 = arith.select %801, %802, %799 : vector<1x8xi1>, vector<1x8xi32>
    %c5_i32_183 = arith.constant 5 : i32
    %804 = vector.broadcast %c5_i32_183 : i32 to vector<1x8xi32>
    %805 = arith.cmpi eq, %771, %804 : vector<1x8xi32>
    %806 = vector.extract_strided_slice %786 {offsets = [5, 0], sizes = [1, 8], strides = [1, 1]} : vector<8x8xi32> to vector<1x8xi32>
    %807 = arith.select %805, %806, %803 : vector<1x8xi1>, vector<1x8xi32>
    %c6_i32_184 = arith.constant 6 : i32
    %808 = vector.broadcast %c6_i32_184 : i32 to vector<1x8xi32>
    %809 = arith.cmpi eq, %771, %808 : vector<1x8xi32>
    %810 = vector.extract_strided_slice %786 {offsets = [6, 0], sizes = [1, 8], strides = [1, 1]} : vector<8x8xi32> to vector<1x8xi32>
    %811 = arith.select %809, %810, %807 : vector<1x8xi1>, vector<1x8xi32>
    %c7_i32_185 = arith.constant 7 : i32
    %812 = vector.broadcast %c7_i32_185 : i32 to vector<1x8xi32>
    %813 = arith.cmpi eq, %771, %812 : vector<1x8xi32>
    %814 = vector.extract_strided_slice %786 {offsets = [7, 0], sizes = [1, 8], strides = [1, 1]} : vector<8x8xi32> to vector<1x8xi32>
    %815 = arith.select %813, %814, %811 : vector<1x8xi1>, vector<1x8xi32>
    %816 = arith.select %784, %815, %771 : vector<1x8xi1>, vector<1x8xi32>
    %817 = vector.extract_strided_slice %7 {offsets = [2, 0], sizes = [1, 8], strides = [1, 1]} : vector<8x8xf32> to vector<1x8xf32>
    %cst_186 = arith.constant 0.000000e+00 : f32
    %818 = vector.broadcast %cst_186 : f32 to vector<1x8xf32>
    %819 = arith.cmpf ogt, %817, %818 : vector<1x8xf32>
    %c0_i32_187 = arith.constant 0 : i32
    %820 = vector.broadcast %c0_i32_187 : i32 to vector<1x8xi32>
    %821 = arith.select %819, %816, %820 : vector<1x8xi1>, vector<1x8xi32>
    %c2_188 = arith.constant 2 : index
    %c0_189 = arith.constant 0 : index
    %822 = vector.load %arg7[%c2_188, %c0_189] : memref<8x8xi32, #tpu.memory_space<vmem>>, vector<1x8xi32>
    tpu.vector_store %arg7[%c2_188, %c0_189], %821 {strides = array<i32>} : memref<8x8xi32, #tpu.memory_space<vmem>>, vector<1x8xi32>,
    %823 = vector.extract_strided_slice %7 {offsets = [1, 0], sizes = [1, 8], strides = [1, 1]} : vector<8x8xf32> to vector<1x8xf32>
    %cst_190 = arith.constant 0.000000e+00 : f32
    %824 = vector.broadcast %cst_190 : f32 to vector<1x8xf32>
    %825 = arith.cmpf ogt, %823, %824 : vector<1x8xf32>
    %826 = vector.extract_strided_slice %7 {offsets = [2, 0], sizes = [1, 8], strides = [1, 1]} : vector<8x8xf32> to vector<1x8xf32>
    %cst_191 = arith.constant 0.000000e+00 : f32
    %827 = vector.broadcast %cst_191 : f32 to vector<1x8xf32>
    %828 = arith.cmpf ogt, %826, %827 : vector<1x8xf32>
    %829 = arith.andi %825, %828 : vector<1x8xi1>
    %c2_192 = arith.constant 2 : index
    %c0_193 = arith.constant 0 : index
    %c0_194 = arith.constant 0 : index
    %830 = vector.load %arg9[%c2_192, %c0_193, %c0_194] : memref<8x8x8xi32, #tpu.memory_space<vmem>>, vector<1x8x8xi32>
    %831 = vector.shape_cast %830 : vector<1x8x8xi32> to vector<8x8xi32>
    %832 = vector.extract_strided_slice %831 {offsets = [0, 0], sizes = [1, 8], strides = [1, 1]} : vector<8x8xi32> to vector<1x8xi32>
    %c1_i32_195 = arith.constant 1 : i32
    %833 = vector.broadcast %c1_i32_195 : i32 to vector<1x8xi32>
    %834 = arith.cmpi eq, %816, %833 : vector<1x8xi32>
    %835 = vector.extract_strided_slice %831 {offsets = [1, 0], sizes = [1, 8], strides = [1, 1]} : vector<8x8xi32> to vector<1x8xi32>
    %836 = arith.select %834, %835, %832 : vector<1x8xi1>, vector<1x8xi32>
    %c2_i32_196 = arith.constant 2 : i32
    %837 = vector.broadcast %c2_i32_196 : i32 to vector<1x8xi32>
    %838 = arith.cmpi eq, %816, %837 : vector<1x8xi32>
    %839 = vector.extract_strided_slice %831 {offsets = [2, 0], sizes = [1, 8], strides = [1, 1]} : vector<8x8xi32> to vector<1x8xi32>
    %840 = arith.select %838, %839, %836 : vector<1x8xi1>, vector<1x8xi32>
    %c3_i32_197 = arith.constant 3 : i32
    %841 = vector.broadcast %c3_i32_197 : i32 to vector<1x8xi32>
    %842 = arith.cmpi eq, %816, %841 : vector<1x8xi32>
    %843 = vector.extract_strided_slice %831 {offsets = [3, 0], sizes = [1, 8], strides = [1, 1]} : vector<8x8xi32> to vector<1x8xi32>
    %844 = arith.select %842, %843, %840 : vector<1x8xi1>, vector<1x8xi32>
    %c4_i32_198 = arith.constant 4 : i32
    %845 = vector.broadcast %c4_i32_198 : i32 to vector<1x8xi32>
    %846 = arith.cmpi eq, %816, %845 : vector<1x8xi32>
    %847 = vector.extract_strided_slice %831 {offsets = [4, 0], sizes = [1, 8], strides = [1, 1]} : vector<8x8xi32> to vector<1x8xi32>
    %848 = arith.select %846, %847, %844 : vector<1x8xi1>, vector<1x8xi32>
    %c5_i32_199 = arith.constant 5 : i32
    %849 = vector.broadcast %c5_i32_199 : i32 to vector<1x8xi32>
    %850 = arith.cmpi eq, %816, %849 : vector<1x8xi32>
    %851 = vector.extract_strided_slice %831 {offsets = [5, 0], sizes = [1, 8], strides = [1, 1]} : vector<8x8xi32> to vector<1x8xi32>
    %852 = arith.select %850, %851, %848 : vector<1x8xi1>, vector<1x8xi32>
    %c6_i32_200 = arith.constant 6 : i32
    %853 = vector.broadcast %c6_i32_200 : i32 to vector<1x8xi32>
    %854 = arith.cmpi eq, %816, %853 : vector<1x8xi32>
    %855 = vector.extract_strided_slice %831 {offsets = [6, 0], sizes = [1, 8], strides = [1, 1]} : vector<8x8xi32> to vector<1x8xi32>
    %856 = arith.select %854, %855, %852 : vector<1x8xi1>, vector<1x8xi32>
    %c7_i32_201 = arith.constant 7 : i32
    %857 = vector.broadcast %c7_i32_201 : i32 to vector<1x8xi32>
    %858 = arith.cmpi eq, %816, %857 : vector<1x8xi32>
    %859 = vector.extract_strided_slice %831 {offsets = [7, 0], sizes = [1, 8], strides = [1, 1]} : vector<8x8xi32> to vector<1x8xi32>
    %860 = arith.select %858, %859, %856 : vector<1x8xi1>, vector<1x8xi32>
    %861 = arith.select %829, %860, %816 : vector<1x8xi1>, vector<1x8xi32>
    %862 = vector.extract_strided_slice %7 {offsets = [1, 0], sizes = [1, 8], strides = [1, 1]} : vector<8x8xf32> to vector<1x8xf32>
    %cst_202 = arith.constant 0.000000e+00 : f32
    %863 = vector.broadcast %cst_202 : f32 to vector<1x8xf32>
    %864 = arith.cmpf ogt, %862, %863 : vector<1x8xf32>
    %c0_i32_203 = arith.constant 0 : i32
    %865 = vector.broadcast %c0_i32_203 : i32 to vector<1x8xi32>
    %866 = arith.select %864, %861, %865 : vector<1x8xi1>, vector<1x8xi32>
    %c1_204 = arith.constant 1 : index
    %c0_205 = arith.constant 0 : index
    %867 = vector.load %arg7[%c1_204, %c0_205] : memref<8x8xi32, #tpu.memory_space<vmem>>, vector<1x8xi32>
    tpu.vector_store %arg7[%c1_204, %c0_205], %866 {strides = array<i32>} : memref<8x8xi32, #tpu.memory_space<vmem>>, vector<1x8xi32>,
    %868 = vector.extract_strided_slice %7 {offsets = [0, 0], sizes = [1, 8], strides = [1, 1]} : vector<8x8xf32> to vector<1x8xf32>
    %cst_206 = arith.constant 0.000000e+00 : f32
    %869 = vector.broadcast %cst_206 : f32 to vector<1x8xf32>
    %870 = arith.cmpf ogt, %868, %869 : vector<1x8xf32>
    %871 = vector.extract_strided_slice %7 {offsets = [1, 0], sizes = [1, 8], strides = [1, 1]} : vector<8x8xf32> to vector<1x8xf32>
    %cst_207 = arith.constant 0.000000e+00 : f32
    %872 = vector.broadcast %cst_207 : f32 to vector<1x8xf32>
    %873 = arith.cmpf ogt, %871, %872 : vector<1x8xf32>
    %874 = arith.andi %870, %873 : vector<1x8xi1>
    %c1_208 = arith.constant 1 : index
    %c0_209 = arith.constant 0 : index
    %c0_210 = arith.constant 0 : index
    %875 = vector.load %arg9[%c1_208, %c0_209, %c0_210] : memref<8x8x8xi32, #tpu.memory_space<vmem>>, vector<1x8x8xi32>
    %876 = vector.shape_cast %875 : vector<1x8x8xi32> to vector<8x8xi32>
    %877 = vector.extract_strided_slice %876 {offsets = [0, 0], sizes = [1, 8], strides = [1, 1]} : vector<8x8xi32> to vector<1x8xi32>
    %c1_i32_211 = arith.constant 1 : i32
    %878 = vector.broadcast %c1_i32_211 : i32 to vector<1x8xi32>
    %879 = arith.cmpi eq, %861, %878 : vector<1x8xi32>
    %880 = vector.extract_strided_slice %876 {offsets = [1, 0], sizes = [1, 8], strides = [1, 1]} : vector<8x8xi32> to vector<1x8xi32>
    %881 = arith.select %879, %880, %877 : vector<1x8xi1>, vector<1x8xi32>
    %c2_i32_212 = arith.constant 2 : i32
    %882 = vector.broadcast %c2_i32_212 : i32 to vector<1x8xi32>
    %883 = arith.cmpi eq, %861, %882 : vector<1x8xi32>
    %884 = vector.extract_strided_slice %876 {offsets = [2, 0], sizes = [1, 8], strides = [1, 1]} : vector<8x8xi32> to vector<1x8xi32>
    %885 = arith.select %883, %884, %881 : vector<1x8xi1>, vector<1x8xi32>
    %c3_i32_213 = arith.constant 3 : i32
    %886 = vector.broadcast %c3_i32_213 : i32 to vector<1x8xi32>
    %887 = arith.cmpi eq, %861, %886 : vector<1x8xi32>
    %888 = vector.extract_strided_slice %876 {offsets = [3, 0], sizes = [1, 8], strides = [1, 1]} : vector<8x8xi32> to vector<1x8xi32>
    %889 = arith.select %887, %888, %885 : vector<1x8xi1>, vector<1x8xi32>
    %c4_i32_214 = arith.constant 4 : i32
    %890 = vector.broadcast %c4_i32_214 : i32 to vector<1x8xi32>
    %891 = arith.cmpi eq, %861, %890 : vector<1x8xi32>
    %892 = vector.extract_strided_slice %876 {offsets = [4, 0], sizes = [1, 8], strides = [1, 1]} : vector<8x8xi32> to vector<1x8xi32>
    %893 = arith.select %891, %892, %889 : vector<1x8xi1>, vector<1x8xi32>
    %c5_i32_215 = arith.constant 5 : i32
    %894 = vector.broadcast %c5_i32_215 : i32 to vector<1x8xi32>
    %895 = arith.cmpi eq, %861, %894 : vector<1x8xi32>
    %896 = vector.extract_strided_slice %876 {offsets = [5, 0], sizes = [1, 8], strides = [1, 1]} : vector<8x8xi32> to vector<1x8xi32>
    %897 = arith.select %895, %896, %893 : vector<1x8xi1>, vector<1x8xi32>
    %c6_i32_216 = arith.constant 6 : i32
    %898 = vector.broadcast %c6_i32_216 : i32 to vector<1x8xi32>
    %899 = arith.cmpi eq, %861, %898 : vector<1x8xi32>
    %900 = vector.extract_strided_slice %876 {offsets = [6, 0], sizes = [1, 8], strides = [1, 1]} : vector<8x8xi32> to vector<1x8xi32>
    %901 = arith.select %899, %900, %897 : vector<1x8xi1>, vector<1x8xi32>
    %c7_i32_217 = arith.constant 7 : i32
    %902 = vector.broadcast %c7_i32_217 : i32 to vector<1x8xi32>
    %903 = arith.cmpi eq, %861, %902 : vector<1x8xi32>
    %904 = vector.extract_strided_slice %876 {offsets = [7, 0], sizes = [1, 8], strides = [1, 1]} : vector<8x8xi32> to vector<1x8xi32>
    %905 = arith.select %903, %904, %901 : vector<1x8xi1>, vector<1x8xi32>
    %906 = arith.select %874, %905, %861 : vector<1x8xi1>, vector<1x8xi32>
    %907 = vector.extract_strided_slice %7 {offsets = [0, 0], sizes = [1, 8], strides = [1, 1]} : vector<8x8xf32> to vector<1x8xf32>
    %cst_218 = arith.constant 0.000000e+00 : f32
    %908 = vector.broadcast %cst_218 : f32 to vector<1x8xf32>
    %909 = arith.cmpf ogt, %907, %908 : vector<1x8xf32>
    %c0_i32_219 = arith.constant 0 : i32
    %910 = vector.broadcast %c0_i32_219 : i32 to vector<1x8xi32>
    %911 = arith.select %909, %906, %910 : vector<1x8xi1>, vector<1x8xi32>
    %c0_220 = arith.constant 0 : index
    %c0_221 = arith.constant 0 : index
    %912 = vector.load %arg7[%c0_220, %c0_221] : memref<8x8xi32, #tpu.memory_space<vmem>>, vector<1x8xi32>
    tpu.vector_store %arg7[%c0_220, %c0_221], %911 {strides = array<i32>} : memref<8x8xi32, #tpu.memory_space<vmem>>, vector<1x8xi32>,
    return
  }
  func.func @transform_0(%arg0: i32) -> (i32, i32, i32) {
    %c0_i32 = arith.constant 0 : i32
    %c0_i32_0 = arith.constant 0 : i32
    %c0_i32_1 = arith.constant 0 : i32
    return %c0_i32, %arg0, %c0_i32_0 : i32, i32, i32
  }
  func.func @transform_1(%arg0: i32) -> (i32, i32) {
    %c0_i32 = arith.constant 0 : i32
    %c0_i32_0 = arith.constant 0 : i32
    return %c0_i32, %arg0 : i32, i32
  }
  func.func @transform_2(%arg0: i32) -> (i32, i32) {
    %c0_i32 = arith.constant 0 : i32
    %c0_i32_0 = arith.constant 0 : i32
    %c0_i32_1 = arith.constant 0 : i32
    return %c0_i32, %c0_i32_0 : i32, i32
  }
  func.func @transform_3(%arg0: i32) -> (i32, i32) {
    %c0_i32 = arith.constant 0 : i32
    %c0_i32_0 = arith.constant 0 : i32
    %c0_i32_1 = arith.constant 0 : i32
    return %c0_i32, %c0_i32_0 : i32, i32
  }
  func.func @transform_4(%arg0: i32) -> (i32, i32) {
    %c0_i32 = arith.constant 0 : i32
    %c0_i32_0 = arith.constant 0 : i32
    %c0_i32_1 = arith.constant 0 : i32
    return %c0_i32, %c0_i32_0 : i32, i32
  }
  func.func @transform_5(%arg0: i32) -> (i32, i32) {
    %c0_i32 = arith.constant 0 : i32
    %c0_i32_0 = arith.constant 0 : i32
    %c0_i32_1 = arith.constant 0 : i32
    return %c0_i32, %c0_i32_0 : i32, i32
  }
  func.func @transform_6(%arg0: i32) -> (i32, i32) {
    %c0_i32 = arith.constant 0 : i32
    %c0_i32_0 = arith.constant 0 : i32
    return %c0_i32, %arg0 : i32, i32
  }
  func.func @transform_7(%arg0: i32) -> (i32, i32) {
    %c0_i32 = arith.constant 0 : i32
    %c0_i32_0 = arith.constant 0 : i32
    return %c0_i32, %arg0 : i32, i32
  }
}

</mosaic_0001>

<bundles_post_ra>
// kernel: crf_viterbi_pallas.1
= control target key start
LH: loop header
LB: loop body
LE: loop exit
PB: predicated region body
PF: predicated region fallthrough
CT: control target
= control target key end

     0   :  { %vm40_vm0 = vcmask 261120   ;;  %v1109_v0 = vmov 0.0|0.0   ;;  %vm1110_vm2 = vmmov 0   ;;  %v1111_v4 = vmov 0.0   ;;  %s1121_s21 = smov 112   ;;  %s1122_s22 = smov 120   ;;  %s1499_s0 = inlined_call_operand.vmem [shape: f32[8,8,32], index: 0, kind: input, shape index: {}]   ;;  %s1500_s4 = inlined_call_operand.vmem [shape: f32[8,8], index: 4, kind: input, shape index: {}]   ;;  %s1501_s3 = inlined_call_operand.vmem [shape: f32[8,1], index: 3, kind: input, shape index: {}]   ;;  %s1502_s2 = inlined_call_operand.vmem [shape: f32[8,32], index: 2, kind: input, shape index: {}]   ;;  %s1503_s1 = inlined_call_operand.vmem [shape: f32[8,8], index: 1, kind: input, shape index: {}]   ;;  %s1504_s5 = inlined_call_operand.vmem [shape: f32[8,1], index: 5, kind: input, shape index: {}]   ;;  %s1505_s7 = inlined_call_operand.vmem [shape: f32[1,8], index: 7, kind: output, shape index: {1}]   ;;  %s1506_s6 = inlined_call_operand.vmem [shape: s32[8,8], index: 6, kind: output, shape index: {0}]  }
   0x1   :  { %1064 = vmatprep.subr.bf16.mxu0 %v1109_v0  ;;  %v25_v1 = vld [vmem:[%s1499_s0] sm:$0xff]  ;;  %v26_v2 = vld [vmem:[%s1499_s0 + $0x8] sm:$0xff]  ;;  %vm1176_vm1 = vmpackc.low %vm40_vm0, %vm40_vm0  ;;  %1061 = vmatprep.mubr.msk.f32.mxu0 %vm1110_vm2, %v1111_v4  ;;  %v1112_v6 = vmov 1   ;;  %v1113_v7 = vmov 0   ;;  %v1114_v13 = vmov 2   ;;  %v1115_v16 = vmov 4  }
   0x2   :  { %v1065_v5 = vpack.c.bf16 %v26_v2, %v25_v1  ;;  %1100 = vset.pattern.permute.xlu1 %v1112_v6  ;;  %1099 = vset.pattern.permute.xlu0 %v1113_v7  ;;  %v139_v8 = vld [vmem:[%s1500_s4] sm:$0xff]  ;;  %v27_v10 = vld [vmem:[%s1499_s0 + $0x10] sm:$0xff]  ;;  %v28_v11 = vld [vmem:[%s1499_s0 + $0x18] sm:$0xff]  ;;  %v1116_v17 = vmov 3   ;;  %v1117_v19 = vmov 5   ;;  %v1118_v20 = vmov 6  }
   0x3   :  { %v34_v9 = vld [vmem:[%s1501_s3] sm:$0xff]  ;;  %148 = vperm.xlu1 %1100, %v139_v8   ;;  %v1069_v12 = vpack.c.bf16 %v28_v11, %v27_v10  ;;  %v30_v15 = vld [vmem:[%s1499_s0 + $0x28] sm:$0xff]  ;;  %v31_v21 = vld [vmem:[%s1499_s0 + $0x30] sm:$0xff]  ;;  %v1119_v24 = vmov 7   ;;  %v140_v26 = vlaneseq  ;;  %v1120_v29 = vmov -10000.0   ;;  %s1124_s23 = smov 104  }
   0x4   :  { %1067 = vmatpush3.bf16.xpose.msk.msra.mxu0 %vm1176_vm1, %v1065_v5  ;;  %37 = vperm.xlu0 %1099, %v34_v9   ;;  %v29_v14 = vld [vmem:[%s1499_s0 + $0x20] sm:$0xff]  ;;  %v32_v22 = vld [vmem:[%s1499_s0 + $0x38] sm:$0xff]  ;;  %vm238_vm10 = vcmask 64512   ;;  %s1125_s24 = smov 80   ;;  %s1126_s25 = smov 88  }
   0x5   :  { %1068 = vmatprep.subr.bf16.mxu0 %v1109_v0  ;;  %v1073_v18 = vpack.c.bf16 %v30_v15, %v29_v14  ;;  %v1077_v23 = vpack.c.bf16 %v32_v22, %v31_v21  ;;  %v33_v25 = vld [vmem:[%s1502_s2] sm:$0xff]  ;;  %v141_v27 = vshrl.u32 %v140_v26, 7  ;;  %s1127_s28 = smov 72  }
   0x6   :  { %v1280_v6 = vld [vmem:[%s1503_s1] sm:$0xff]  ;;  %s1123_s1 = smov 96  }
   0x7   :  { %1101 = vset.pattern.permute.xlu1 %v1114_v13  ;;  %vm175_vm3 = vcmp.eq.s32.totalorder %v141_v27, 6  ;;  %v1219_v28 = vsub.s32 1, %v141_v27  ;;  %v1223_v31 = vsub.s32 2, %v141_v27  ;;  %v1225_v32 = vsub.s32 0, %v141_v27 }
   0x8   :  { %152 = vperm.xlu1 %1101, %v139_v8   ;;  %144 = vperm.xlu0 %1099, %v139_v8   ;;  %v1221_v30 = vsel %vm175_vm3, 0.0, %v1120_v29  ;;  %v1235_v38 = vsub.s32 4, %v141_v27  ;;  %v1237_v39 = vsub.s32 3, %v141_v27  ;;  %v1250_v47 = vsub.s32 5, %v141_v27 }
   0x9   :  { %v185_v33 = vrot.slane %v1221_v30, %v1219_v28  ;;  %v193_v36 = vrot.slane %v1221_v30, %v1223_v31  ;;  %v180_v37 = vrot.slane %v1221_v30, %v1225_v32  ;;  %v1252_v49 = vsub.s32 6, %v141_v27 }
   0xa   :  { %v209_v45 = vrot.slane %v1221_v30, %v1235_v38  ;;  %v201_v46 = vrot.slane %v1221_v30, %v1237_v39  ;;  %v217_v55 = vrot.slane %v1221_v30, %v1250_v47  ;;  %v1264_v57 = vsub.s32 7, %v141_v27  ;;  %v761_v27 = vld [vmem:[%s1504_s5] sm:$0xff] }
   0xb   :  { %v225_v56 = vrot.slane %v1221_v30, %v1252_v49  ;;  %vm241_vm12 = vcmp.gt.f32.partialorder %v1280_v6, 0.0 }
   0xc   :  { %1071 = vmatpush3.bf16.xpose.msk.msra.mxu0 %vm1176_vm1, %v1069_v12  ;;  %1103 = vset.pattern.permute.xlu1 %v1115_v16 }
   0xd   :  { %1072 = vmatprep.subr.bf16.mxu0 %v1109_v0  ;;  %1102 = vset.pattern.permute.xlu0 %v1116_v17 }
   0xe   :  { %160 = vperm.xlu1 %1103, %v139_v8   ;;  %156 = vperm.xlu0 %1102, %v139_v8  }
  0x12   :  { %1104 = vset.pattern.permute.xlu1 %v1117_v19  ;;  %1105 = vset.pattern.permute.xlu0 %v1118_v20 }
  0x13   :  { %164 = vperm.xlu1 %1104, %v139_v8   ;;  %168 = vperm.xlu0 %1105, %v139_v8  }
  0x14   :  { %1075 = vmatpush3.bf16.xpose.msk.msra.mxu0 %vm1176_vm1, %v1073_v18 }
  0x15   :  { %1076 = vmatprep.subr.bf16.mxu0 %v1109_v0  ;;  %v233_v0 = vrot.slane %v1221_v30, %v1264_v57 }
  0x17   :  { %1106 = vset.pattern.permute.xlu1 %v1119_v24  ;;  %1108 = vset.pattern.permute.xlu0 %v1113_v7 }
  0x18   :  { %172 = vperm.xlu1 %1106, %v139_v8   ;;  %v1286_v8 = vsel %vm241_vm12, 1, %v1113_v7 }
  0x19   :  { %v246_v9 = vrot.slane %v1286_v8, %v1225_v32 }
  0x1b   :  { %vm247_vm13 = vcmp.eq.s32.totalorder %v246_v9, 1 }
  0x1c   :  { %1079 = vmatpush3.bf16.xpose.msk.msra.mxu0 %vm1176_vm1, %v1077_v23  ;;  %1107 = vset.pattern.permute.xlu1 %v1113_v7 }
  0x23   :  { %1062 = vmatmul.mubr.msk.f32.vlgmr.msra.gmra.mrb[0].mxu0 %vm40_vm0, %v33_v25 }
  0x82   :  { %v1229_v34 = vpop.permute.xlu1 %148 }
  0x83   :  { %v38_v35 = vpop.permute.xlu0 %37  ;;  %v186_v40 = vadd.f32 %v185_v33, %v1229_v34 }
  0x87   :  { %v1240_v41 = vpop.permute.xlu1 %152  ;;  %v1242_v42 = vpop.permute.xlu0 %144 }
  0x88   :  { %v194_v43 = vadd.f32 %v193_v36, %v1240_v41  ;;  %v181_v44 = vadd.f32 %v180_v37, %v1242_v42 }
  0x8a   :  { %vm187_vm4 = vcmp.gt.f32.partialorder %v186_v40, %v181_v44 }
  0x8b   :  { %v188_v48 = vsel %vm187_vm4, %v186_v40, %v181_v44 }
  0x8c   :  { %vm195_vm5 = vcmp.gt.f32.partialorder %v194_v43, %v188_v48 }
  0x8d   :  { %v1254_v50 = vpop.permute.xlu1 %160  ;;  %v1256_v51 = vpop.permute.xlu0 %156  ;;  %v196_v53 = vsel %vm195_vm5, %v194_v43, %v188_v48 }
  0x8e   :  { %v210_v52 = vadd.f32 %v209_v45, %v1254_v50  ;;  %v202_v54 = vadd.f32 %v201_v46, %v1256_v51 }
  0x90   :  { %vm203_vm6 = vcmp.gt.f32.partialorder %v202_v54, %v196_v53 }
  0x91   :  { %v204_v58 = vsel %vm203_vm6, %v202_v54, %v196_v53 }
  0x92   :  { %v1266_v59 = vpop.permute.xlu1 %164  ;;  %vm211_vm7 = vcmp.gt.f32.partialorder %v210_v52, %v204_v58  ;;  %v1269_v62 = vpop.permute.xlu0 %168 }
  0x93   :  { %v212_v60 = vsel %vm211_vm7, %v210_v52, %v204_v58  ;;  %v218_v61 = vadd.f32 %v217_v55, %v1266_v59  ;;  %v226_v63 = vadd.f32 %v225_v56, %v1269_v62 }
  0x95   :  { %vm219_vm8 = vcmp.gt.f32.partialorder %v218_v61, %v212_v60 }
  0x96   :  { %v220_v1 = vsel %vm219_vm8, %v218_v61, %v212_v60  ;;  %v320_v60 = vrot.slane %v1286_v8, %v1219_v28 }
  0x97   :  { %vm227_vm9 = vcmp.gt.f32.partialorder %v226_v63, %v220_v1  ;;  %v1274_v2 = vpop.permute.xlu1 %172 }
  0x98   :  { %v228_v3 = vsel %vm227_vm9, %v226_v63, %v220_v1  ;;  %v234_v4 = vadd.f32 %v233_v0, %v1274_v2  ;;  %vm321_vm5 = vcmp.eq.s32.totalorder %v320_v60, 1 }
  0x9a   :  { %vm235_vm11 = vcmp.gt.f32.partialorder %v234_v4, %v228_v3 }
  0x9b   :  { %v236_v5 = vsel %vm235_vm11, %v234_v4, %v228_v3 }
  0xf6   :  { %v134_v10 = vpop.f32.mrb[0].mxu0 }
  0xf7   :  { %v135_v11 = vadd.f32 %v134_v10, %v38_v35  ;;  %v1063_v12 = vpop.f32.mrb[1].mxu0 }
  0xf9   :  { %v240_v13 = vadd.f32 %v236_v5, %v135_v11  ;;  %386 = vrot.lane.b32.xlu0 %v135_v11, %s1121_s21  ;;  %313 = vrot.lane.b32.xlu1 %v135_v11, %s1122_s22 }
  0xfb   :  { %v248_v14 = vsel %vm247_vm13, %v240_v13, %v1221_v30 }
  0xfc   :  { %v252_v15 = vrot.slane %v248_v14, %v1225_v32  ;;  %v257_v16 = vrot.slane %v248_v14, %v1219_v28  ;;  %v265_v17 = vrot.slane %v248_v14, %v1223_v31  ;;  %v273_v20 = vrot.slane %v248_v14, %v1237_v39 }
  0xfd   :  { %532 = vrot.lane.b32.xlu0 %v135_v11, %s1123_s1  ;;  %459 = vrot.lane.b32.xlu1 %v135_v11, %s1124_s23  ;;  %v281_v22 = vrot.slane %v248_v14, %v1235_v38  ;;  %v289_v26 = vrot.slane %v248_v14, %v1250_v47  ;;  %v297_v35 = vrot.slane %v248_v14, %v1252_v49 }
  0xfe   :  { %v253_v18 = vadd.f32 %v252_v15, %v1242_v42  ;;  %v258_v19 = vadd.f32 %v257_v16, %v1229_v34  ;;  %v266_v21 = vadd.f32 %v265_v17, %v1240_v41  ;;  %v274_v25 = vadd.f32 %v273_v20, %v1256_v51 }
  0xff   :  { %v282_v33 = vadd.f32 %v281_v22, %v1254_v50  ;;  %v290_v40 = vadd.f32 %v289_v26, %v1266_v59  ;;  %v305_v43 = vrot.slane %v248_v14, %v1264_v57  ;;  %v298_v46 = vadd.f32 %v297_v35, %v1269_v62 }
 0x100   :  { %vm259_vm14 = vcmp.gt.f32.partialorder %v258_v19, %v253_v18 }
 0x101   :  { %678 = vrot.lane.b32.xlu0 %v135_v11, %s1125_s24  ;;  %605 = vrot.lane.b32.xlu1 %v135_v11, %s1126_s25  ;;  %v260_v23 = vsel %vm259_vm14, %v258_v19, %v253_v18  ;;  %v261_v24 = vsel %vm259_vm14, 1, %v1113_v7  ;;  %v306_v53 = vadd.f32 %v305_v43, %v1274_v2 }
 0x102   :  { %vm267_vm15 = vcmp.gt.f32.partialorder %v266_v21, %v260_v23 }
 0x103   :  { %v268_v29 = vsel %vm267_vm15, %v266_v21, %v260_v23  ;;  %v269_v30 = vsel %vm267_vm15, 2, %v261_v24 }
 0x104   :  { %vm275_vm0 = vcmp.gt.f32.partialorder %v274_v25, %v268_v29 }
 0x105   :  { %751 = vrot.lane.b32.xlu0 %v135_v11, %s1127_s28  ;;  %v276_v36 = vsel %vm275_vm0, %v274_v25, %v268_v29  ;;  %v277_v37 = vsel %vm275_vm0, 3, %v269_v30  ;;  %764 = vperm.xlu1 %1107, %v761_v27  }
 0x106   :  { %vm283_vm1 = vcmp.gt.f32.partialorder %v282_v33, %v276_v36 }
 0x107   :  { %v284_v44 = vsel %vm283_vm1, %v282_v33, %v276_v36  ;;  %v285_v45 = vsel %vm283_vm1, 4, %v277_v37  ;;  %v393_v33 = vrot.slane %v1286_v8, %v1223_v31 }
 0x108   :  { %vm291_vm2 = vcmp.gt.f32.partialorder %v290_v40, %v284_v44 }
 0x109   :  { %v292_v48 = vsel %vm291_vm2, %v290_v40, %v284_v44  ;;  %v293_v52 = vsel %vm291_vm2, 5, %v285_v45  ;;  %vm394_vm15 = vcmp.eq.s32.totalorder %v393_v33, 1 }
 0x10a   :  { %vm299_vm3 = vcmp.gt.f32.partialorder %v298_v46, %v292_v48 }
 0x10b   :  { %v300_v54 = vsel %vm299_vm3, %v298_v46, %v292_v48  ;;  %v301_v55 = vsel %vm299_vm3, 6, %v293_v52 }
 0x10c   :  { %vm307_vm4 = vcmp.gt.f32.partialorder %v306_v53, %v300_v54 }
 0x10d   :  { %v308_v56 = vsel %vm307_vm4, %v306_v53, %v300_v54  ;;  %v309_v58 = vsel %vm307_vm4, 7, %v301_v55 }
 0x10e   :  { %311 = vst.msk [vmem:[#allocation2 + $0x8] sm:$0xff] %vm238_vm10, %v309_v58 }
 0x16b   :  { %v314_v61 = vpop.permute.xlu1 %313  ;;  %v387_v40 = vpop.permute.xlu0 %386 }
 0x16c   :  { %v316_v63 = vadd.f32 %v314_v61, %v308_v56 }
 0x16e   :  { %v322_v0 = vsel %vm321_vm5, %v316_v63, %v248_v14 }
 0x16f   :  { %v326_v1 = vrot.slane %v322_v0, %v1225_v32  ;;  %v331_v3 = vrot.slane %v322_v0, %v1219_v28  ;;  %v339_v4 = vrot.slane %v322_v0, %v1223_v31  ;;  %v347_v10 = vrot.slane %v322_v0, %v1237_v39 }
 0x170   :  { %v355_v12 = vrot.slane %v322_v0, %v1235_v38  ;;  %v363_v16 = vrot.slane %v322_v0, %v1250_v47  ;;  %v371_v20 = vrot.slane %v322_v0, %v1252_v49  ;;  %v379_v24 = vrot.slane %v322_v0, %v1264_v57 }
 0x171   :  { %v327_v5 = vadd.f32 %v326_v1, %v1242_v42  ;;  %v332_v9 = vadd.f32 %v331_v3, %v1229_v34  ;;  %v340_v11 = vadd.f32 %v339_v4, %v1240_v41  ;;  %v348_v15 = vadd.f32 %v347_v10, %v1256_v51 }
 0x172   :  { %v356_v19 = vadd.f32 %v355_v12, %v1254_v50  ;;  %v364_v23 = vadd.f32 %v363_v16, %v1266_v59  ;;  %v372_v27 = vadd.f32 %v371_v20, %v1269_v62  ;;  %v380_v35 = vadd.f32 %v379_v24, %v1274_v2 }
 0x173   :  { %vm333_vm6 = vcmp.gt.f32.partialorder %v332_v9, %v327_v5 }
 0x174   :  { %v334_v13 = vsel %vm333_vm6, %v332_v9, %v327_v5  ;;  %v335_v14 = vsel %vm333_vm6, 1, %v1113_v7 }
 0x175   :  { %vm341_vm7 = vcmp.gt.f32.partialorder %v340_v11, %v334_v13 }
 0x176   :  { %v342_v17 = vsel %vm341_vm7, %v340_v11, %v334_v13  ;;  %v343_v18 = vsel %vm341_vm7, 2, %v335_v14 }
 0x177   :  { %vm349_vm8 = vcmp.gt.f32.partialorder %v348_v15, %v342_v17 }
 0x178   :  { %v350_v21 = vsel %vm349_vm8, %v348_v15, %v342_v17  ;;  %v351_v22 = vsel %vm349_vm8, 3, %v343_v18  ;;  %v466_v17 = vrot.slane %v1286_v8, %v1237_v39 }
 0x179   :  { %vm357_vm9 = vcmp.gt.f32.partialorder %v356_v19, %v350_v21 }
 0x17a   :  { %v358_v25 = vsel %vm357_vm9, %v356_v19, %v350_v21  ;;  %v359_v26 = vsel %vm357_vm9, 4, %v351_v22  ;;  %vm467_vm7 = vcmp.eq.s32.totalorder %v466_v17, 1 }
 0x17b   :  { %vm365_vm11 = vcmp.gt.f32.partialorder %v364_v23, %v358_v25 }
 0x17c   :  { %v366_v29 = vsel %vm365_vm11, %v364_v23, %v358_v25  ;;  %v367_v30 = vsel %vm365_vm11, 5, %v359_v26  ;;  %v460_v23 = vpop.permute.xlu1 %459 }
 0x17d   :  { %vm373_vm13 = vcmp.gt.f32.partialorder %v372_v27, %v366_v29 }
 0x17e   :  { %v374_v36 = vsel %vm373_vm13, %v372_v27, %v366_v29  ;;  %v375_v37 = vsel %vm373_vm13, 6, %v367_v30 }
 0x17f   :  { %vm381_vm14 = vcmp.gt.f32.partialorder %v380_v35, %v374_v36 }
 0x180   :  { %v382_v43 = vsel %vm381_vm14, %v380_v35, %v374_v36  ;;  %v383_v44 = vsel %vm381_vm14, 7, %v375_v37 }
 0x181   :  { %385 = vst.msk [vmem:[#allocation2 + $0x10] sm:$0xff] %vm238_vm10, %v383_v44  ;;  %v389_v45 = vadd.f32 %v387_v40, %v382_v43 }
 0x183   :  { %v395_v46 = vsel %vm394_vm15, %v389_v45, %v322_v0 }
 0x184   :  { %v399_v48 = vrot.slane %v395_v46, %v1225_v32  ;;  %v404_v52 = vrot.slane %v395_v46, %v1219_v28  ;;  %v412_v53 = vrot.slane %v395_v46, %v1223_v31  ;;  %v420_v56 = vrot.slane %v395_v46, %v1237_v39 }
 0x185   :  { %v428_v60 = vrot.slane %v395_v46, %v1235_v38  ;;  %v436_v1 = vrot.slane %v395_v46, %v1250_v47  ;;  %v444_v9 = vrot.slane %v395_v46, %v1252_v49  ;;  %v452_v13 = vrot.slane %v395_v46, %v1264_v57 }
 0x186   :  { %v400_v54 = vadd.f32 %v399_v48, %v1242_v42  ;;  %v405_v55 = vadd.f32 %v404_v52, %v1229_v34  ;;  %v413_v58 = vadd.f32 %v412_v53, %v1240_v41  ;;  %v421_v0 = vadd.f32 %v420_v56, %v1256_v51 }
 0x187   :  { %v429_v5 = vadd.f32 %v428_v60, %v1254_v50  ;;  %v437_v12 = vadd.f32 %v436_v1, %v1266_v59  ;;  %v445_v16 = vadd.f32 %v444_v9, %v1269_v62  ;;  %v453_v20 = vadd.f32 %v452_v13, %v1274_v2 }
 0x188   :  { %vm406_vm0 = vcmp.gt.f32.partialorder %v405_v55, %v400_v54 }
 0x189   :  { %v407_v61 = vsel %vm406_vm0, %v405_v55, %v400_v54  ;;  %v408_v63 = vsel %vm406_vm0, 1, %v1113_v7 }
 0x18a   :  { %vm414_vm1 = vcmp.gt.f32.partialorder %v413_v58, %v407_v61 }
 0x18b   :  { %v415_v3 = vsel %vm414_vm1, %v413_v58, %v407_v61  ;;  %v416_v4 = vsel %vm414_vm1, 2, %v408_v63 }
 0x18c   :  { %vm422_vm2 = vcmp.gt.f32.partialorder %v421_v0, %v415_v3 }
 0x18d   :  { %v423_v10 = vsel %vm422_vm2, %v421_v0, %v415_v3  ;;  %v424_v11 = vsel %vm422_vm2, 3, %v416_v4 }
 0x18e   :  { %vm430_vm3 = vcmp.gt.f32.partialorder %v429_v5, %v423_v10 }
 0x18f   :  { %v431_v14 = vsel %vm430_vm3, %v429_v5, %v423_v10  ;;  %v432_v15 = vsel %vm430_vm3, 4, %v424_v11  ;;  %v539_v5 = vrot.slane %v1286_v8, %v1235_v38 }
 0x190   :  { %vm438_vm4 = vcmp.gt.f32.partialorder %v437_v12, %v431_v14 }
 0x191   :  { %v439_v18 = vsel %vm438_vm4, %v437_v12, %v431_v14  ;;  %v440_v19 = vsel %vm438_vm4, 5, %v432_v15  ;;  %v533_v12 = vpop.permute.xlu0 %532  ;;  %vm540_vm1 = vcmp.eq.s32.totalorder %v539_v5, 1 }
 0x192   :  { %vm446_vm5 = vcmp.gt.f32.partialorder %v445_v16, %v439_v18 }
 0x193   :  { %v447_v21 = vsel %vm446_vm5, %v445_v16, %v439_v18  ;;  %v448_v22 = vsel %vm446_vm5, 6, %v440_v19 }
 0x194   :  { %vm454_vm6 = vcmp.gt.f32.partialorder %v453_v20, %v447_v21 }
 0x195   :  { %v455_v24 = vsel %vm454_vm6, %v453_v20, %v447_v21  ;;  %v456_v25 = vsel %vm454_vm6, 7, %v448_v22 }
 0x196   :  { %458 = vst.msk [vmem:[#allocation2 + $0x18] sm:$0xff] %vm238_vm10, %v456_v25  ;;  %v462_v26 = vadd.f32 %v460_v23, %v455_v24 }
 0x198   :  { %v468_v27 = vsel %vm467_vm7, %v462_v26, %v395_v46 }
 0x199   :  { %v472_v29 = vrot.slane %v468_v27, %v1225_v32  ;;  %v477_v30 = vrot.slane %v468_v27, %v1219_v28  ;;  %v485_v33 = vrot.slane %v468_v27, %v1223_v31  ;;  %v493_v37 = vrot.slane %v468_v27, %v1237_v39 }
 0x19a   :  { %v501_v43 = vrot.slane %v468_v27, %v1235_v38  ;;  %v509_v48 = vrot.slane %v468_v27, %v1250_v47  ;;  %v517_v55 = vrot.slane %v468_v27, %v1252_v49  ;;  %v525_v61 = vrot.slane %v468_v27, %v1264_v57 }
 0x19b   :  { %v473_v35 = vadd.f32 %v472_v29, %v1242_v42  ;;  %v478_v36 = vadd.f32 %v477_v30, %v1229_v34  ;;  %v486_v40 = vadd.f32 %v485_v33, %v1240_v41  ;;  %v494_v46 = vadd.f32 %v493_v37, %v1256_v51 }
 0x19c   :  { %v502_v54 = vadd.f32 %v501_v43, %v1254_v50  ;;  %v510_v60 = vadd.f32 %v509_v48, %v1266_v59  ;;  %v518_v1 = vadd.f32 %v517_v55, %v1269_v62  ;;  %v526_v9 = vadd.f32 %v525_v61, %v1274_v2 }
 0x19d   :  { %vm479_vm8 = vcmp.gt.f32.partialorder %v478_v36, %v473_v35 }
 0x19e   :  { %v480_v44 = vsel %vm479_vm8, %v478_v36, %v473_v35  ;;  %v481_v45 = vsel %vm479_vm8, 1, %v1113_v7 }
 0x19f   :  { %vm487_vm9 = vcmp.gt.f32.partialorder %v486_v40, %v480_v44 }
 0x1a0   :  { %v488_v52 = vsel %vm487_vm9, %v486_v40, %v480_v44  ;;  %v489_v53 = vsel %vm487_vm9, 2, %v481_v45 }
 0x1a1   :  { %vm495_vm11 = vcmp.gt.f32.partialorder %v494_v46, %v488_v52 }
 0x1a2   :  { %v496_v56 = vsel %vm495_vm11, %v494_v46, %v488_v52  ;;  %v497_v58 = vsel %vm495_vm11, 3, %v489_v53  ;;  %v612_v52 = vrot.slane %v1286_v8, %v1250_v47 }
 0x1a3   :  { %vm503_vm13 = vcmp.gt.f32.partialorder %v502_v54, %v496_v56 }
 0x1a4   :  { %v504_v63 = vsel %vm503_vm13, %v502_v54, %v496_v56  ;;  %v505_v0 = vsel %vm503_vm13, 4, %v497_v58  ;;  %vm613_vm9 = vcmp.eq.s32.totalorder %v612_v52, 1 }
 0x1a5   :  { %vm511_vm14 = vcmp.gt.f32.partialorder %v510_v60, %v504_v63 }
 0x1a6   :  { %v512_v3 = vsel %vm511_vm14, %v510_v60, %v504_v63  ;;  %v513_v4 = vsel %vm511_vm14, 5, %v505_v0  ;;  %v606_v60 = vpop.permute.xlu1 %605 }
 0x1a7   :  { %vm519_vm15 = vcmp.gt.f32.partialorder %v518_v1, %v512_v3 }
 0x1a8   :  { %v520_v10 = vsel %vm519_vm15, %v518_v1, %v512_v3  ;;  %v521_v11 = vsel %vm519_vm15, 6, %v513_v4 }
 0x1a9   :  { %vm527_vm0 = vcmp.gt.f32.partialorder %v526_v9, %v520_v10 }
 0x1aa   :  { %v528_v13 = vsel %vm527_vm0, %v526_v9, %v520_v10  ;;  %v529_v14 = vsel %vm527_vm0, 7, %v521_v11 }
 0x1ab   :  { %531 = vst.msk [vmem:[#allocation2 + $0x20] sm:$0xff] %vm238_vm10, %v529_v14  ;;  %v535_v15 = vadd.f32 %v533_v12, %v528_v13 }
 0x1ad   :  { %v541_v16 = vsel %vm540_vm1, %v535_v15, %v468_v27 }
 0x1ae   :  { %v545_v17 = vrot.slane %v541_v16, %v1225_v32  ;;  %v550_v18 = vrot.slane %v541_v16, %v1219_v28  ;;  %v558_v19 = vrot.slane %v541_v16, %v1223_v31  ;;  %v566_v22 = vrot.slane %v541_v16, %v1237_v39 }
 0x1af   :  { %v574_v24 = vrot.slane %v541_v16, %v1235_v38  ;;  %v582_v29 = vrot.slane %v541_v16, %v1250_v47  ;;  %v590_v36 = vrot.slane %v541_v16, %v1252_v49  ;;  %v598_v44 = vrot.slane %v541_v16, %v1264_v57 }
 0x1b0   :  { %v546_v20 = vadd.f32 %v545_v17, %v1242_v42  ;;  %v551_v21 = vadd.f32 %v550_v18, %v1229_v34  ;;  %v559_v23 = vadd.f32 %v558_v19, %v1240_v41  ;;  %v567_v27 = vadd.f32 %v566_v22, %v1256_v51 }
 0x1b1   :  { %v575_v35 = vadd.f32 %v574_v24, %v1254_v50  ;;  %v583_v43 = vadd.f32 %v582_v29, %v1266_v59  ;;  %v591_v48 = vadd.f32 %v590_v36, %v1269_v62  ;;  %v599_v55 = vadd.f32 %v598_v44, %v1274_v2 }
 0x1b2   :  { %vm552_vm2 = vcmp.gt.f32.partialorder %v551_v21, %v546_v20 }
 0x1b3   :  { %v553_v25 = vsel %vm552_vm2, %v551_v21, %v546_v20  ;;  %v554_v26 = vsel %vm552_vm2, 1, %v1113_v7 }
 0x1b4   :  { %vm560_vm3 = vcmp.gt.f32.partialorder %v559_v23, %v553_v25 }
 0x1b5   :  { %v561_v30 = vsel %vm560_vm3, %v559_v23, %v553_v25  ;;  %v562_v33 = vsel %vm560_vm3, 2, %v554_v26 }
 0x1b6   :  { %vm568_vm4 = vcmp.gt.f32.partialorder %v567_v27, %v561_v30 }
 0x1b7   :  { %v569_v37 = vsel %vm568_vm4, %v567_v27, %v561_v30  ;;  %v570_v40 = vsel %vm568_vm4, 3, %v562_v33  ;;  %v685_v30 = vrot.slane %v1286_v8, %v1252_v49 }
 0x1b8   :  { %vm576_vm5 = vcmp.gt.f32.partialorder %v575_v35, %v569_v37 }
 0x1b9   :  { %v577_v45 = vsel %vm576_vm5, %v575_v35, %v569_v37  ;;  %v578_v46 = vsel %vm576_vm5, 4, %v570_v40  ;;  %vm686_vm3 = vcmp.eq.s32.totalorder %v685_v30, 1 }
 0x1ba   :  { %vm584_vm6 = vcmp.gt.f32.partialorder %v583_v43, %v577_v45 }
 0x1bb   :  { %v585_v53 = vsel %vm584_vm6, %v583_v43, %v577_v45  ;;  %v586_v54 = vsel %vm584_vm6, 5, %v578_v46  ;;  %v679_v43 = vpop.permute.xlu0 %678 }
 0x1bc   :  { %vm592_vm7 = vcmp.gt.f32.partialorder %v591_v48, %v585_v53 }
 0x1bd   :  { %v593_v56 = vsel %vm592_vm7, %v591_v48, %v585_v53  ;;  %v594_v58 = vsel %vm592_vm7, 6, %v586_v54 }
 0x1be   :  { %vm600_vm8 = vcmp.gt.f32.partialorder %v599_v55, %v593_v56 }
 0x1bf   :  { %v601_v61 = vsel %vm600_vm8, %v599_v55, %v593_v56  ;;  %v602_v63 = vsel %vm600_vm8, 7, %v594_v58 }
 0x1c0   :  { %604 = vst.msk [vmem:[#allocation2 + $0x28] sm:$0xff] %vm238_vm10, %v602_v63  ;;  %v608_v0 = vadd.f32 %v606_v60, %v601_v61 }
 0x1c2   :  { %v614_v1 = vsel %vm613_vm9, %v608_v0, %v541_v16 }
 0x1c3   :  { %v618_v3 = vrot.slane %v614_v1, %v1225_v32  ;;  %v623_v4 = vrot.slane %v614_v1, %v1219_v28  ;;  %v631_v5 = vrot.slane %v614_v1, %v1223_v31  ;;  %v639_v11 = vrot.slane %v614_v1, %v1237_v39 }
 0x1c4   :  { %v647_v13 = vrot.slane %v614_v1, %v1235_v38  ;;  %v655_v17 = vrot.slane %v614_v1, %v1250_v47  ;;  %v663_v21 = vrot.slane %v614_v1, %v1252_v49  ;;  %v671_v25 = vrot.slane %v614_v1, %v1264_v57 }
 0x1c5   :  { %v619_v9 = vadd.f32 %v618_v3, %v1242_v42  ;;  %v624_v10 = vadd.f32 %v623_v4, %v1229_v34  ;;  %v632_v12 = vadd.f32 %v631_v5, %v1240_v41  ;;  %v640_v16 = vadd.f32 %v639_v11, %v1256_v51 }
 0x1c6   :  { %v648_v20 = vadd.f32 %v647_v13, %v1254_v50  ;;  %v656_v24 = vadd.f32 %v655_v17, %v1266_v59  ;;  %v664_v29 = vadd.f32 %v663_v21, %v1269_v62  ;;  %v672_v36 = vadd.f32 %v671_v25, %v1274_v2 }
 0x1c7   :  { %vm625_vm11 = vcmp.gt.f32.partialorder %v624_v10, %v619_v9 }
 0x1c8   :  { %v626_v14 = vsel %vm625_vm11, %v624_v10, %v619_v9  ;;  %v627_v15 = vsel %vm625_vm11, 1, %v1113_v7  ;;  %v758_v10 = vrot.slane %v1286_v8, %v1264_v57 }
 0x1c9   :  { %vm633_vm13 = vcmp.gt.f32.partialorder %v632_v12, %v626_v14 }
 0x1ca   :  { %v634_v18 = vsel %vm633_vm13, %v632_v12, %v626_v14  ;;  %v635_v19 = vsel %vm633_vm13, 2, %v627_v15  ;;  %v752_v12 = vpop.permute.xlu0 %751  ;;  %vm759_vm13 = vcmp.eq.s32.totalorder %v758_v10, 1  ;;  %v765_v15 = vpop.permute.xlu1 %764 }
 0x1cb   :  { %vm641_vm14 = vcmp.gt.f32.partialorder %v640_v16, %v634_v18 }
 0x1cc   :  { %v642_v22 = vsel %vm641_vm14, %v640_v16, %v634_v18  ;;  %v643_v23 = vsel %vm641_vm14, 3, %v635_v19 }
 0x1cd   :  { %vm649_vm15 = vcmp.gt.f32.partialorder %v648_v20, %v642_v22 }
 0x1ce   :  { %v650_v26 = vsel %vm649_vm15, %v648_v20, %v642_v22  ;;  %v651_v27 = vsel %vm649_vm15, 4, %v643_v23 }
 0x1cf   :  { %vm657_vm0 = vcmp.gt.f32.partialorder %v656_v24, %v650_v26 }
 0x1d0   :  { %v658_v33 = vsel %vm657_vm0, %v656_v24, %v650_v26  ;;  %v659_v35 = vsel %vm657_vm0, 5, %v651_v27 }
 0x1d1   :  { %vm665_vm1 = vcmp.gt.f32.partialorder %v664_v29, %v658_v33 }
 0x1d2   :  { %v666_v37 = vsel %vm665_vm1, %v664_v29, %v658_v33  ;;  %v667_v40 = vsel %vm665_vm1, 6, %v659_v35 }
 0x1d3   :  { %vm673_vm2 = vcmp.gt.f32.partialorder %v672_v36, %v666_v37 }
 0x1d4   :  { %v674_v44 = vsel %vm673_vm2, %v672_v36, %v666_v37  ;;  %v675_v45 = vsel %vm673_vm2, 7, %v667_v40 }
 0x1d5   :  { %677 = vst.msk [vmem:[#allocation2 + $0x30] sm:$0xff] %vm238_vm10, %v675_v45  ;;  %v681_v46 = vadd.f32 %v679_v43, %v674_v44 }
 0x1d7   :  { %v687_v48 = vsel %vm686_vm3, %v681_v46, %v614_v1  ;;  %vm816_vm3 = vcmask 64519  }
 0x1d8   :  { %v691_v52 = vrot.slane %v687_v48, %v1225_v32  ;;  %v696_v53 = vrot.slane %v687_v48, %v1219_v28  ;;  %v704_v54 = vrot.slane %v687_v48, %v1223_v31  ;;  %v712_v58 = vrot.slane %v687_v48, %v1237_v39 }
 0x1d9   :  { %v720_v61 = vrot.slane %v687_v48, %v1235_v38  ;;  %v728_v28 = vrot.slane %v687_v48, %v1250_v47  ;;  %v736_v39 = vrot.slane %v687_v48, %v1252_v49 }
 0x1da   :  { %v692_v55 = vadd.f32 %v691_v52, %v1242_v42  ;;  %v697_v56 = vadd.f32 %v696_v53, %v1229_v34  ;;  %v705_v60 = vadd.f32 %v704_v54, %v1240_v41  ;;  %v713_v32 = vadd.f32 %v712_v58, %v1256_v51 }
 0x1db   :  { %v721_v34 = vadd.f32 %v720_v61, %v1254_v50  ;;  %v729_v38 = vadd.f32 %v728_v28, %v1266_v59  ;;  %v744_v41 = vrot.slane %v687_v48, %v1264_v57  ;;  %v737_v51 = vadd.f32 %v736_v39, %v1269_v62 }
 0x1dc   :  { %vm698_vm4 = vcmp.gt.f32.partialorder %v697_v56, %v692_v55  ;;  %v820_v52 = vrot.slane %v1286_v8, 1 }
 0x1dd   :  { %v699_v63 = vsel %vm698_vm4, %v697_v56, %v692_v55  ;;  %v700_v0 = vsel %vm698_vm4, 1, %v1113_v7  ;;  %v745_v49 = vadd.f32 %v744_v41, %v1274_v2 }
 0x1de   :  { %vm706_vm5 = vcmp.gt.f32.partialorder %v705_v60, %v699_v63 }
 0x1df   :  { %v707_v31 = vsel %vm706_vm5, %v705_v60, %v699_v63  ;;  %v708_v1 = vsel %vm706_vm5, 2, %v700_v0 }
 0x1e0   :  { %vm714_vm6 = vcmp.gt.f32.partialorder %v713_v32, %v707_v31 }
 0x1e1   :  { %v715_v42 = vsel %vm714_vm6, %v713_v32, %v707_v31  ;;  %v716_v3 = vsel %vm714_vm6, 3, %v708_v1 }
 0x1e2   :  { %vm722_vm7 = vcmp.gt.f32.partialorder %v721_v34, %v715_v42 }
 0x1e3   :  { %v723_v4 = vsel %vm722_vm7, %v721_v34, %v715_v42  ;;  %v724_v5 = vsel %vm722_vm7, 4, %v716_v3  ;;  %v851_v3 = vld [vmem:[#allocation2 + $0x30] sm:$0xff] }
 0x1e4   :  { %vm730_vm8 = vcmp.gt.f32.partialorder %v729_v38, %v723_v4 }
 0x1e5   :  { %v731_v47 = vsel %vm730_vm8, %v729_v38, %v723_v4  ;;  %v732_v9 = vsel %vm730_vm8, 5, %v724_v5  ;;  %v853_v5 = vrot.slane %v851_v3, 3 }
 0x1e6   :  { %vm738_vm9 = vcmp.gt.f32.partialorder %v737_v51, %v731_v47 }
 0x1e7   :  { %v739_v50 = vsel %vm738_vm9, %v737_v51, %v731_v47  ;;  %v740_v11 = vsel %vm738_vm9, 6, %v732_v9  ;;  %vm821_vm9 = vcmp.ne.s32.totalorder %v820_v52, 0  ;;  %v854_v51 = vrot.slane %v851_v3, 2 }
 0x1e8   :  { %vm746_vm11 = vcmp.gt.f32.partialorder %v745_v49, %v739_v50  ;;  %v857_v9 = vrot.slane %v851_v3, 4 }
 0x1e9   :  { %v747_v59 = vsel %vm746_vm11, %v745_v49, %v739_v50  ;;  %v748_v13 = vsel %vm746_vm11, 7, %v740_v11  ;;  %v860_v49 = vrot.slane %v851_v3, 5  ;;  %v863_v11 = vrot.slane %v851_v3, 6 }
 0x1ea   :  { %750 = vst.msk [vmem:[#allocation2 + $0x38] sm:$0xff] %vm238_vm10, %v748_v13  ;;  %v754_v14 = vadd.f32 %v752_v12, %v747_v59  ;;  %v866_v59 = vrot.slane %v851_v3, 7 }
 0x1ec   :  { %v760_v62 = vsel %vm759_vm13, %v754_v14, %v687_v48 }
 0x1ed   :  { %v767_v16 = vadd.f32 %v765_v15, %v760_v62  ;;  %v871_v15 = vrot.slane %v851_v3, 1 }
 0x1ef   :  { %v769_v17 = vrot.slane %v767_v16, 7 }
 0x1f1   :  { %vm771_vm14 = vcmp.gt.f32.partialorder %v767_v16, %v769_v17  ;;  %v823_v45 = vld [vmem:[#allocation2 + $0x38] sm:$0xff] }
 0x1f2   :  { %v772_v18 = vsel %vm771_vm14, %v767_v16, %v769_v17  ;;  %v773_v57 = vsel %vm771_vm14, 1, %v1113_v7  ;;  %v825_v53 = vrot.slane %v823_v45, 2  ;;  %v826_v54 = vrot.slane %v823_v45, 1  ;;  %v879_v17 = vld [vmem:[#allocation2 + $0x28] sm:$0xff] }
 0x1f3   :  { %v775_v19 = vrot.slane %v772_v18, 7  ;;  %v779_v2 = vrot.slane %v773_v57, 7  ;;  %v829_v58 = vrot.slane %v823_v45, 3  ;;  %v832_v61 = vrot.slane %v823_v45, 4 }
 0x1f4   :  { %v835_v63 = vrot.slane %v823_v45, 5  ;;  %v838_v32 = vrot.slane %v823_v45, 6  ;;  %v841_v31 = vrot.slane %v823_v45, 7 }
 0x1f5   :  { %vm777_vm15 = vcmp.gt.f32.partialorder %v767_v16, %v775_v19 }
 0x1f6   :  { %v778_v20 = vsel %vm777_vm15, %v767_v16, %v775_v19  ;;  %v780_v21 = vsel %vm777_vm15, 2, %v779_v2  ;;  %vm1446_vm15 = vmand %vm241_vm12, %vm821_vm9  ;;  %v881_v2 = vrot.slane %v879_v17, 4 }
 0x1f7   :  { %v782_v22 = vrot.slane %v778_v20, 7  ;;  %v786_v23 = vrot.slane %v780_v21, 7  ;;  %v882_v20 = vrot.slane %v879_v17, 3 }
 0x1f9   :  { %vm784_vm0 = vcmp.gt.f32.partialorder %v767_v16, %v782_v22 }
 0x1fa   :  { %v785_v24 = vsel %vm784_vm0, %v767_v16, %v782_v22  ;;  %v787_v25 = vsel %vm784_vm0, 3, %v786_v23  ;;  %vm849_vm0 = vcmask 63494   ;;  %v885_v22 = vrot.slane %v879_v17, 5 }
 0x1fb   :  { %v789_v26 = vrot.slane %v785_v24, 7  ;;  %v793_v27 = vrot.slane %v787_v25, 7  ;;  %v888_v24 = vrot.slane %v879_v17, 6 }
 0x1fd   :  { %vm791_vm10 = vcmp.gt.f32.partialorder %v767_v16, %v789_v26 }
 0x1fe   :  { %v792_v29 = vsel %vm791_vm10, %v767_v16, %v789_v26  ;;  %v794_v30 = vsel %vm791_vm10, 4, %v793_v27  ;;  %v891_v26 = vrot.slane %v879_v17, 7 }
 0x1ff   :  { %v796_v33 = vrot.slane %v792_v29, 7  ;;  %v800_v35 = vrot.slane %v794_v30, 7  ;;  %v896_v30 = vrot.slane %v879_v17, 1 }
 0x201   :  { %vm798_vm1 = vcmp.gt.f32.partialorder %v767_v16, %v796_v33 }
 0x202   :  { %v799_v36 = vsel %vm798_vm1, %v767_v16, %v796_v33  ;;  %v801_v7 = vsel %vm798_vm1, 5, %v800_v35  ;;  %v899_v35 = vrot.slane %v879_v17, 2 }
 0x203   :  { %v803_v37 = vrot.slane %v799_v36, 7  ;;  %v807_v40 = vrot.slane %v801_v7, 7 }
 0x205   :  { %vm805_vm2 = vcmp.gt.f32.partialorder %v767_v16, %v803_v37 }
 0x206   :  { %v806_v43 = vsel %vm805_vm2, %v767_v16, %v803_v37  ;;  %v808_v44 = vsel %vm805_vm2, 6, %v807_v40  ;;  %v907_v37 = vld [vmem:[#allocation2 + $0x20] sm:$0xff] }
 0x207   :  { %v810_v46 = vrot.slane %v806_v43, 7  ;;  %v814_v48 = vrot.slane %v808_v44, 7  ;;  %v913_v52 = vrot.slane %v907_v37, 6 }
 0x209   :  { %vm812_vm4 = vcmp.gt.f32.partialorder %v767_v16, %v810_v46 }
 0x20a   :  { %v813_v55 = vsel %vm812_vm4, %v767_v16, %v810_v46  ;;  %v815_v56 = vsel %vm812_vm4, 7, %v814_v48  ;;  %v910_v46 = vrot.slane %v907_v37, 4 }
 0x20b   :  { %817 = vst.msk [vmem:[%s1505_s7 - $0x7] sm:$0x80] %vm816_vm3, %v813_v55  ;;  %v818_v60 = vsel %vm241_vm12, %v815_v56, 0  ;;  %vm824_vm5 = vcmp.eq.s32.totalorder %v815_v56, 1  ;;  %vm828_vm6 = vcmp.eq.s32.totalorder %v815_v56, 2  ;;  %vm831_vm7 = vcmp.eq.s32.totalorder %v815_v56, 3 }
 0x20c   :  { %819 = vst.msk [vmem:[%s1506_s6] sm:$0x80] %vm816_vm3, %v818_v60  ;;  %v827_v8 = vsel %vm824_vm5, %v825_v53, %v826_v54  ;;  %vm834_vm8 = vcmp.eq.s32.totalorder %v815_v56, 4  ;;  %vm837_vm11 = vcmp.eq.s32.totalorder %v815_v56, 5  ;;  %vm840_vm13 = vcmp.eq.s32.totalorder %v815_v56, 6 }
 0x20d   :  { %v830_v0 = vsel %vm828_vm6, %v829_v58, %v827_v8  ;;  %vm843_vm14 = vcmp.eq.s32.totalorder %v815_v56, 7  ;;  %v846_v4 = vrot.slane %v815_v56, 1  ;;  %v916_v54 = vrot.slane %v907_v37, 7 }
 0x20e   :  { %v833_v28 = vsel %vm831_vm7, %v832_v61, %v830_v0  ;;  %vm877_vm7 = vcmask 62469   ;;  %v921_v58 = vrot.slane %v907_v37, 1  ;;  %v924_v61 = vrot.slane %v907_v37, 2 }
 0x20f   :  { %v836_v1 = vsel %vm834_vm8, %v835_v63, %v833_v28  ;;  %v927_v63 = vrot.slane %v907_v37, 3  ;;  %v935_v28 = vld [vmem:[#allocation2 + $0x18] sm:$0xff] }
 0x210   :  { %v839_v34 = vsel %vm837_vm11, %v838_v32, %v836_v1 }
 0x211   :  { %v842_v39 = vsel %vm840_vm13, %v841_v31, %v839_v34 }
 0x212   :  { %v844_v38 = vsel %vm843_vm14, %v823_v45, %v842_v39  ;;  %v909_v45 = vrot.slane %v907_v37, 5  ;;  %v937_v39 = vrot.slane %v935_v28, 6 }
 0x213   :  { %v845_v41 = vrot.slane %v844_v38, 1 }
 0x215   :  { %v847_v47 = vsel %vm1446_vm15, %v845_v41, %v846_v4  ;;  %v941_v41 = vrot.slane %v935_v28, 7 }
 0x216   :  { %v848_v10 = vsel %vm241_vm12, %v847_v47, 0  ;;  %vm852_vm10 = vcmp.eq.s32.totalorder %v847_v47, 1  ;;  %vm856_vm1 = vcmp.eq.s32.totalorder %v847_v47, 2  ;;  %vm859_vm2 = vcmp.eq.s32.totalorder %v847_v47, 3 }
 0x217   :  { %850 = vst.msk [vmem:[%s1506_s6] sm:$0x40] %vm849_vm0, %v848_v10  ;;  %v855_v50 = vsel %vm852_vm10, %v853_v5, %v854_v51  ;;  %vm862_vm3 = vcmp.eq.s32.totalorder %v847_v47, 4  ;;  %vm865_vm4 = vcmp.eq.s32.totalorder %v847_v47, 5  ;;  %vm868_vm5 = vcmp.eq.s32.totalorder %v847_v47, 6 }
 0x218   :  { %v858_v12 = vsel %vm856_vm1, %v857_v9, %v855_v50  ;;  %vm870_vm6 = vcmp.eq.s32.totalorder %v847_v47, 7  ;;  %v874_v19 = vrot.slane %v847_v47, 1  ;;  %vm905_vm1 = vcmask 61444  }
 0x219   :  { %v861_v13 = vsel %vm859_vm2, %v860_v49, %v858_v12  ;;  %v946_v51 = vrot.slane %v935_v28, 1  ;;  %v949_v9 = vrot.slane %v935_v28, 2  ;;  %v952_v49 = vrot.slane %v935_v28, 3 }
 0x21a   :  { %v864_v14 = vsel %vm862_vm3, %v863_v11, %v861_v13  ;;  %v955_v11 = vrot.slane %v935_v28, 4  ;;  %v963_v13 = vld [vmem:[#allocation2 + $0x10] sm:$0xff] }
 0x21b   :  { %v867_v62 = vsel %vm865_vm4, %v866_v59, %v864_v14 }
 0x21c   :  { %v869_v16 = vsel %vm868_vm5, %v851_v3, %v867_v62  ;;  %v938_v3 = vrot.slane %v935_v28, 5 }
 0x21d   :  { %v872_v18 = vsel %vm870_vm6, %v871_v15, %v869_v16  ;;  %v965_v16 = vrot.slane %v963_v13, 7 }
 0x21e   :  { %v873_v57 = vrot.slane %v872_v18, 1 }
 0x220   :  { %v875_v21 = vsel %vm1446_vm15, %v873_v57, %v874_v19  ;;  %v971_v19 = vrot.slane %v963_v13, 1 }
 0x221   :  { %v876_v23 = vsel %vm241_vm12, %v875_v21, 0  ;;  %vm880_vm8 = vcmp.eq.s32.totalorder %v875_v21, 1  ;;  %vm884_vm9 = vcmp.eq.s32.totalorder %v875_v21, 2  ;;  %vm887_vm11 = vcmp.eq.s32.totalorder %v875_v21, 3 }
 0x222   :  { %878 = vst.msk [vmem:[%s1506_s6] sm:$0x20] %vm877_vm7, %v876_v23  ;;  %v883_v25 = vsel %vm880_vm8, %v881_v2, %v882_v20  ;;  %vm890_vm13 = vcmp.eq.s32.totalorder %v875_v21, 4  ;;  %vm893_vm14 = vcmp.eq.s32.totalorder %v875_v21, 5  ;;  %vm895_vm0 = vcmp.eq.s32.totalorder %v875_v21, 6 }
 0x223   :  { %v886_v27 = vsel %vm884_vm9, %v885_v22, %v883_v25  ;;  %vm898_vm10 = vcmp.eq.s32.totalorder %v875_v21, 7  ;;  %v902_v44 = vrot.slane %v875_v21, 1  ;;  %vm933_vm9 = vcmask 60419  }
 0x224   :  { %v889_v29 = vsel %vm887_vm11, %v888_v24, %v886_v27  ;;  %v974_v20 = vrot.slane %v963_v13, 2  ;;  %v977_v22 = vrot.slane %v963_v13, 3  ;;  %v980_v24 = vrot.slane %v963_v13, 4 }
 0x225   :  { %v892_v33 = vsel %vm890_vm13, %v891_v26, %v889_v29  ;;  %v983_v26 = vrot.slane %v963_v13, 5 }
 0x226   :  { %v894_v36 = vsel %vm893_vm14, %v879_v17, %v892_v33  ;;  %v966_v17 = vrot.slane %v963_v13, 6 }
 0x227   :  { %v897_v7 = vsel %vm895_vm0, %v896_v30, %v894_v36  ;;  %v991_v30 = vld [vmem:[#allocation2 + $0x8] sm:$0xff] }
 0x228   :  { %v900_v40 = vsel %vm898_vm10, %v899_v35, %v897_v7  ;;  %v993_v7 = vrot.slane %v991_v30, 7 }
 0x229   :  { %v901_v43 = vrot.slane %v900_v40, 1  ;;  %v996_v40 = vrot.slane %v991_v30, 1 }
 0x22b   :  { %v903_v48 = vsel %vm1446_vm15, %v901_v43, %v902_v44  ;;  %v999_v44 = vrot.slane %v991_v30, 2 }
 0x22c   :  { %v904_v53 = vsel %vm241_vm12, %v903_v48, 0  ;;  %vm908_vm2 = vcmp.eq.s32.totalorder %v903_v48, 1  ;;  %vm912_vm3 = vcmp.eq.s32.totalorder %v903_v48, 2  ;;  %vm915_vm4 = vcmp.eq.s32.totalorder %v903_v48, 3 }
 0x22d   :  { %906 = vst.msk [vmem:[%s1506_s6] sm:$0x10] %vm905_vm1, %v904_v53  ;;  %v911_v55 = vsel %vm908_vm2, %v909_v45, %v910_v46  ;;  %vm918_vm5 = vcmp.eq.s32.totalorder %v903_v48, 4  ;;  %vm920_vm6 = vcmp.eq.s32.totalorder %v903_v48, 5  ;;  %vm923_vm7 = vcmp.eq.s32.totalorder %v903_v48, 6 }
 0x22e   :  { %v914_v56 = vsel %vm912_vm3, %v913_v52, %v911_v55  ;;  %vm926_vm8 = vcmp.eq.s32.totalorder %v903_v48, 7  ;;  %v930_v34 = vrot.slane %v903_v48, 1  ;;  %vm961_vm3 = vcmask 59394  }
 0x22f   :  { %v917_v60 = vsel %vm915_vm4, %v916_v54, %v914_v56  ;;  %v1002_v46 = vrot.slane %v991_v30, 3  ;;  %v1005_v52 = vrot.slane %v991_v30, 4  ;;  %v1008_v54 = vrot.slane %v991_v30, 5 }
 0x230   :  { %v919_v8 = vsel %vm918_vm5, %v907_v37, %v917_v60  ;;  %v1011_v56 = vrot.slane %v991_v30, 6 }
 0x231   :  { %v922_v0 = vsel %vm920_vm6, %v921_v58, %v919_v8 }
 0x232   :  { %v925_v32 = vsel %vm923_vm7, %v924_v61, %v922_v0 }
 0x233   :  { %v928_v31 = vsel %vm926_vm8, %v927_v63, %v925_v32 }
 0x234   :  { %v929_v1 = vrot.slane %v928_v31, 1 }
 0x236   :  { %v931_v38 = vsel %vm1446_vm15, %v929_v1, %v930_v34 }
 0x237   :  { %v932_v4 = vsel %vm241_vm12, %v931_v38, 0  ;;  %vm936_vm11 = vcmp.eq.s32.totalorder %v931_v38, 1  ;;  %vm940_vm13 = vcmp.eq.s32.totalorder %v931_v38, 2  ;;  %vm943_vm14 = vcmp.eq.s32.totalorder %v931_v38, 3 }
 0x238   :  { %934 = vst.msk [vmem:[%s1506_s6] sm:$0x8] %vm933_vm9, %v932_v4  ;;  %v939_v5 = vsel %vm936_vm11, %v937_v39, %v938_v3  ;;  %vm945_vm0 = vcmp.eq.s32.totalorder %v931_v38, 4  ;;  %vm948_vm10 = vcmp.eq.s32.totalorder %v931_v38, 5  ;;  %vm951_vm1 = vcmp.eq.s32.totalorder %v931_v38, 6 }
 0x239   :  { %v942_v47 = vsel %vm940_vm13, %v941_v41, %v939_v5  ;;  %vm954_vm2 = vcmp.eq.s32.totalorder %v931_v38, 7  ;;  %v958_v62 = vrot.slane %v931_v38, 1  ;;  %vm989_vm13 = vcmask 58369  }
 0x23a   :  { %v944_v10 = vsel %vm943_vm14, %v935_v28, %v942_v47 }
 0x23b   :  { %v947_v50 = vsel %vm945_vm0, %v946_v51, %v944_v10 }
 0x23c   :  { %v950_v12 = vsel %vm948_vm10, %v949_v9, %v947_v50 }
 0x23d   :  { %v953_v59 = vsel %vm951_vm1, %v952_v49, %v950_v12 }
 0x23e   :  { %v956_v14 = vsel %vm954_vm2, %v955_v11, %v953_v59 }
 0x23f   :  { %v957_v15 = vrot.slane %v956_v14, 1 }
 0x241   :  { %v959_v18 = vsel %vm1446_vm15, %v957_v15, %v958_v62 }
 0x242   :  { %v960_v57 = vsel %vm241_vm12, %v959_v18, 0  ;;  %vm964_vm4 = vcmp.eq.s32.totalorder %v959_v18, 1  ;;  %vm968_vm5 = vcmp.eq.s32.totalorder %v959_v18, 2  ;;  %vm970_vm6 = vcmp.eq.s32.totalorder %v959_v18, 3 }
 0x243   :  { %962 = vst.msk [vmem:[%s1506_s6] sm:$0x4] %vm961_vm3, %v960_v57  ;;  %v967_v2 = vsel %vm964_vm4, %v965_v16, %v966_v17  ;;  %vm973_vm7 = vcmp.eq.s32.totalorder %v959_v18, 4  ;;  %vm976_vm8 = vcmp.eq.s32.totalorder %v959_v18, 5  ;;  %vm979_vm9 = vcmp.eq.s32.totalorder %v959_v18, 6 }
 0x244   :  { %v969_v21 = vsel %vm968_vm5, %v963_v13, %v967_v2  ;;  %vm982_vm11 = vcmp.eq.s32.totalorder %v959_v18, 7  ;;  %v986_v36 = vrot.slane %v959_v18, 1  ;;  %vm1017_vm5 = vcmask 57344  }
 0x245   :  { %v972_v23 = vsel %vm970_vm6, %v971_v19, %v969_v21 }
 0x246   :  { %v975_v25 = vsel %vm973_vm7, %v974_v20, %v972_v23 }
 0x247   :  { %v978_v27 = vsel %vm976_vm8, %v977_v22, %v975_v25 }
 0x248   :  { %v981_v29 = vsel %vm979_vm9, %v980_v24, %v978_v27 }
 0x249   :  { %v984_v33 = vsel %vm982_vm11, %v983_v26, %v981_v29 }
 0x24a   :  { %v985_v35 = vrot.slane %v984_v33, 1 }
 0x24c   :  { %v987_v37 = vsel %vm1446_vm15, %v985_v35, %v986_v36 }
 0x24d   :  { %v988_v43 = vsel %vm241_vm12, %v987_v37, 0  ;;  %vm992_vm14 = vcmp.eq.s32.totalorder %v987_v37, 1  ;;  %vm995_vm0 = vcmp.eq.s32.totalorder %v987_v37, 2  ;;  %vm998_vm10 = vcmp.eq.s32.totalorder %v987_v37, 3 }
 0x24e   :  { %990 = vst.msk [vmem:[%s1506_s6] sm:$0x2] %vm989_vm13, %v988_v43  ;;  %v994_v45 = vsel %vm992_vm14, %v991_v30, %v993_v7  ;;  %vm1001_vm1 = vcmp.eq.s32.totalorder %v987_v37, 4  ;;  %vm1004_vm2 = vcmp.eq.s32.totalorder %v987_v37, 5  ;;  %vm1007_vm3 = vcmp.eq.s32.totalorder %v987_v37, 6 }
 0x24f   :  { %v997_v48 = vsel %vm995_vm0, %v996_v40, %v994_v45  ;;  %vm1010_vm4 = vcmp.eq.s32.totalorder %v987_v37, 7  ;;  %v1014_v63 = vrot.slane %v987_v37, 1 }
 0x250   :  { %v1000_v53 = vsel %vm998_vm10, %v999_v44, %v997_v48 }
 0x251   :  { %v1003_v55 = vsel %vm1001_vm1, %v1002_v46, %v1000_v53 }
 0x252   :  { %v1006_v58 = vsel %vm1004_vm2, %v1005_v52, %v1003_v55 }
 0x253   :  { %v1009_v60 = vsel %vm1007_vm3, %v1008_v54, %v1006_v58 }
 0x254   :  { %v1012_v61 = vsel %vm1010_vm4, %v1011_v56, %v1009_v60 }
 0x255   :  { %v1013_v8 = vrot.slane %v1012_v61, 1 }
 0x257   :  { %v1015_v0 = vsel %vm1446_vm15, %v1013_v8, %v1014_v63 }
 0x258   :  { %v1016_v32 = vsel %vm241_vm12, %v1015_v0, 0 }
 0x259   :  { %1018 = vst.msk [vmem:[%s1506_s6] sm:$0x1] %vm1017_vm5, %v1016_v32 }

</bundles_post_ra>
